<compile_context>
chip_gen: v6e
topology: v6e:2x2x1
jax: 0.10.0
libtpu: 0.0.40
codegen_flags: <defaults>
</compile_context>

<pallas_src>
import functools

import jax
import jax.numpy as jnp
from jax.experimental import pallas as pl
from jax.experimental.pallas import tpu as pltpu


# ----------------------------------------------------------------------------
# Pallas kernel: one direction of one bidirectional LSTM layer, whole sequence.
# Grid axis 0 = direction (0 = forward, 1 = backward), marked "parallel".
# ----------------------------------------------------------------------------
def _bilstm_layer_kernel(x_ref, wih_ref, whh_ref, b_ref, y_ref, hN_ref, gates_scr):
    # x_ref:     (P, T, B, Din)  -- P feature parts (P=1 first layer, 2 after)
    # wih_ref:   (1, P*Din, 4H)  -- this direction's input weights
    # whh_ref:   (1, H, 4H)      -- this direction's recurrent weights
    # b_ref:     (1, 1, 4H)      -- combined bias (b_ih + b_hh)
    # y_ref:     (1, T, B, H)    -- this direction's output, chronological rows
    # hN_ref:    (1, B, H)       -- this direction's final hidden state
    # gates_scr: (T, B, 4H) f32  -- precomputed input-projection gate slab
    P, T, B, Din = x_ref.shape
    H = whh_ref.shape[1]

    # --- Hoisted input projection: one MXU matmul with M = T*B per part. ---
    x_all = x_ref[...]
    gin = b_ref[0].astype(jnp.float32)                      # (1, 4H), broadcasts
    for p in range(P):                                      # P is static (1 or 2)
        xp = x_all[p].reshape(T * B, Din)
        wp = wih_ref[0, p * Din:(p + 1) * Din, :]
        gin = gin + jnp.dot(xp, wp, preferred_element_type=jnp.float32)
    gates_scr[...] = gin.reshape(T, B, 4 * H)

    # --- Recurrence: in-kernel time loop; per step only h @ W_hh + gates. ---
    d = pl.program_id(0)                   # 0 = forward, 1 = backward
    t0 = jnp.where(d == 0, 0, T - 1)
    sgn = jnp.where(d == 0, 1, -1)
    whh = whh_ref[0]                       # (H, 4H), resident across the loop
    # Precomputed (hoisted) lane mask: gate order i, f, g, o (PyTorch); g -> tanh.
    lane = jax.lax.broadcasted_iota(jnp.int32, (B, 4 * H), 1)
    g_mask = (lane >= 2 * H) & (lane < 3 * H)
    y_dir = y_ref.at[0]                    # (T, B, H) view of this direction's block

    def step(s, carry):
        h, c = carry
        t = t0 + sgn * s                   # chronological timestep index
        gates = gates_scr[t] + jnp.dot(h, whh, preferred_element_type=jnp.float32)
        act = jnp.where(g_mask, jnp.tanh(gates), jax.nn.sigmoid(gates))
        i = act[:, 0 * H:1 * H]
        f = act[:, 1 * H:2 * H]
        g = act[:, 2 * H:3 * H]
        o = act[:, 3 * H:4 * H]
        c = f * c + i * g
        h = o * jnp.tanh(c)
        y_dir[t] = h.astype(y_ref.dtype)   # backward dir writes rows already reversed
        return h, c

    h0 = jnp.zeros((B, H), jnp.float32)
    c0 = jnp.zeros((B, H), jnp.float32)
    hT, _ = jax.lax.fori_loop(0, T, step, (h0, c0), unroll=True)
    hN_ref[0] = hT.astype(hN_ref.dtype)    # final hidden written once, after the loop


def bilstm_layer(x_parts, w_ih, w_hh, b):
    """x_parts: (P, T, B, Din); w_ih: (2, P*Din, 4H); w_hh: (2, H, 4H); b: (2, 1, 4H).
    Returns y: (2, T, B, H)  [dir 0 = fwd, dir 1 = bwd, rows in chronological order]
            h_n: (2, B, H)   final hidden per direction."""
    P, T, B, Din = x_parts.shape
    H = w_hh.shape[1]
    y, h_n = pl.pallas_call(
        _bilstm_layer_kernel,
        out_shape=(
            jax.ShapeDtypeStruct((2, T, B, H), x_parts.dtype),
            jax.ShapeDtypeStruct((2, B, H), x_parts.dtype),
        ),
        grid=(2,),
        in_specs=[
            pl.BlockSpec((P, T, B, Din), lambda d: (0, 0, 0, 0)),
            pl.BlockSpec((1, P * Din, 4 * H), lambda d: (d, 0, 0)),
            pl.BlockSpec((1, H, 4 * H), lambda d: (d, 0, 0)),
            pl.BlockSpec((1, 1, 4 * H), lambda d: (d, 0, 0)),
        ],
        out_specs=(
            pl.BlockSpec((1, T, B, H), lambda d: (d, 0, 0, 0)),
            pl.BlockSpec((1, B, H), lambda d: (d, 0, 0)),
        ),
        scratch_shapes=[pltpu.VMEM((T, B, 4 * H), jnp.float32)],
        compiler_params=pltpu.CompilerParams(
            dimension_semantics=("parallel",)),
    )(x_parts, w_ih, w_hh, b)
    return y, h_n


# ----------------------------------------------------------------------------
# Full MultiLSTM forward (inference).
# ----------------------------------------------------------------------------
def multi_lstm_forward(x, params, num_layers, output_dim):
    """x: (B, T, input_dim), batch_first like the PyTorch module."""
    B, T, D = x.shape
    Bp = ((B + 7) // 8) * 8                           # pad batch to 8 sublanes
    xt = jnp.transpose(x, (1, 0, 2))                  # (T, B, D) time-major
    xt = jnp.pad(xt, ((0, 0), (0, Bp - B), (0, 0)))
    layer_in = xt[None]                               # (1, T, Bp, D)
    h_n = None
    for l in range(num_layers):
        w_ih, w_hh, b = params["lstm1"][l]
        layer_in, h_n = bilstm_layer(layer_in, w_ih, w_hh, b)   # (2, T, Bp, H)

    # torch.cat((h_out[-1], h_out[-2]), -1) == cat(last-layer backward, forward)
    h_cat = jnp.concatenate([h_n[1, :B], h_n[0, :B]], axis=-1)  # (B, 2H)

    # dropout1: identity at inference.
    # TODO(synk): training-mode dropout masking not implemented (inference path only).
    # lstm2 is dead code in the reference forward (its hidden state is never used).
    # Head (fc1 -> fc2 -> sigmoid) left to plain XLA per perf review: a separate
    # pallas_call launch + DMA costs more than this tiny matmul chain; XLA fuses it.
    z1 = h_cat @ params["fc1_w"] + params["fc1_b"]
    z2 = z1 @ params["fc2_w"] + params["fc2_b"]
    out = jax.nn.sigmoid(z2)

    # reference: reshape (B,1,·) -> fc2 -> sigmoid -> squeeze(1) -> squeeze(1)
    if output_dim == 1:
        out = out[:, 0]                               # (B,)
    return out


# ----------------------------------------------------------------------------
# Deterministic parameter initialization (uniform(-1/sqrt(H), 1/sqrt(H)),
# mirroring PyTorch's default LSTM/Linear init scale).
# ----------------------------------------------------------------------------
def _uniform(key, shape, scale):
    return jax.random.uniform(key, shape, jnp.float32, -scale, scale)


def init_params(key, input_dim, input_dim2, hidden_dim, hidden_dim2, output_dim,
                num_layers):
    del hidden_dim2  # only constrains input_dim2 == 2*hidden_dim2 in the reference
    params = {"lstm1": []}
    scale1 = 1.0 / (hidden_dim ** 0.5)
    keys = jax.random.split(key, num_layers * 3 + 4)
    ki = 0
    for l in range(num_layers):
        in_size = input_dim if l == 0 else 2 * hidden_dim
        # Stacked per direction: index 0 = forward, 1 = backward.
        w_ih = _uniform(keys[ki], (2, in_size, 4 * hidden_dim), scale1); ki += 1
        w_hh = _uniform(keys[ki], (2, hidden_dim, 4 * hidden_dim), scale1); ki += 1
        # combined bias (b_ih + b_hh); TODO(synk): PyTorch draws two independent
        # uniforms and sums them, so random-init distribution differs slightly
        # (forward math is identical when loading real weights).
        b = _uniform(keys[ki], (2, 1, 4 * hidden_dim), scale1); ki += 1
        params["lstm1"].append((w_ih, w_hh, b))

    scale_fc1 = 1.0 / ((2 * hidden_dim) ** 0.5)
    params["fc1_w"] = _uniform(keys[ki], (2 * hidden_dim, input_dim2), scale_fc1); ki += 1
    params["fc1_b"] = _uniform(keys[ki], (1, input_dim2), scale_fc1); ki += 1
    scale_fc2 = 1.0 / (input_dim2 ** 0.5)
    params["fc2_w"] = _uniform(keys[ki], (input_dim2, output_dim), scale_fc2); ki += 1
    params["fc2_b"] = _uniform(keys[ki], (1, output_dim), scale_fc2); ki += 1
    return params


if __name__ == "__main__":
    # Small shapes consistent with the module:
    B, T = 4, 8
    input_dim = 16
    hidden_dim = 32
    hidden_dim2 = 16
    input_dim2 = 2 * hidden_dim2  # = 32; required so fc2(2*hidden_dim2 -> out) accepts fc1's output
    output_dim = 1
    num_layers = 2
    # bidirectional = True (required by the reference's h_out[-1]/h_out[-2] cat)

    key = jax.random.PRNGKey(0)
    kx, kp = jax.random.split(key)
    x = jax.random.normal(kx, (B, T, input_dim), jnp.float32)
    params = init_params(kp, input_dim, input_dim2, hidden_dim, hidden_dim2,
                         output_dim, num_layers)

    fwd = jax.jit(functools.partial(multi_lstm_forward, num_layers=num_layers,
                                    output_dim=output_dim))
    out = jax.block_until_ready(fwd(x, params))
    assert out.shape == (B,), out.shape
    assert bool(jnp.all(jnp.isfinite(out)))
    assert bool(jnp.all((out >= 0.0) & (out <= 1.0)))  # sigmoid output
    print("KERNEL_OK")
</pallas_src>

<mosaic_0001>
module attributes {stable_mosaic.version = 11 : i64} {
  func.func @_bilstm_layer_kernel(%arg0: i32, %arg1: memref<2x8x8x32xf32, #tpu.memory_space<vmem>>, %arg2: memref<1x64x128xf32, #tpu.memory_space<vmem>>, %arg3: memref<1x32x128xf32, #tpu.memory_space<vmem>>, %arg4: memref<1x1x128xf32, #tpu.memory_space<vmem>>, %arg5: memref<1x8x8x32xf32, #tpu.memory_space<vmem>>, %arg6: memref<1x8x32xf32, #tpu.memory_space<vmem>>, %arg7: memref<8x8x128xf32, #tpu.memory_space<vmem>>) attributes {dimension_semantics = [#tpu.dimension_semantics<parallel>], iteration_bounds = array<i64: 2>, scalar_prefetch = 0 : i64, scratch_operands = 1 : i64, tpu.core_type = #tpu.core_type<tc>, window_params = [{pipeline_mode = #tpu.pipeline_mode<synchronous>, transform_indices = @transform_0, window_bounds = array<i64: 2, 8, 8, 32>}, {transform_indices = @transform_1, window_bounds = array<i64: 1, 64, 128>}, {transform_indices = @transform_2, window_bounds = array<i64: 1, 32, 128>}, {transform_indices = @transform_3, window_bounds = array<i64: 1, 1, 128>}, {transform_indices = @transform_4, window_bounds = array<i64: 1, 8, 8, 32>}, {transform_indices = @transform_5, window_bounds = array<i64: 1, 8, 32>}]} {
    %c0 = arith.constant 0 : index
    %c0_0 = arith.constant 0 : index
    %c0_1 = arith.constant 0 : index
    %c0_2 = arith.constant 0 : index
    %0 = vector.load %arg1[%c0, %c0_0, %c0_1, %c0_2] : memref<2x8x8x32xf32, #tpu.memory_space<vmem>>, vector<2x8x8x32xf32>
    %c0_3 = arith.constant 0 : index
    %c0_4 = arith.constant 0 : index
    %c0_5 = arith.constant 0 : index
    %1 = vector.load %arg4[%c0_3, %c0_4, %c0_5] : memref<1x1x128xf32, #tpu.memory_space<vmem>>, vector<1x1x128xf32>
    %2 = vector.shape_cast %1 : vector<1x1x128xf32> to vector<1x128xf32>
    %3 = vector.extract_strided_slice %0 {offsets = [0, 0, 0, 0], sizes = [1, 8, 8, 32], strides = [1, 1, 1, 1]} : vector<2x8x8x32xf32> to vector<1x8x8x32xf32>
    %4 = vector.shape_cast %3 : vector<1x8x8x32xf32> to vector<8x8x32xf32>
    %5 = vector.shape_cast %4 : vector<8x8x32xf32> to vector<64x32xf32>
    %c0_6 = arith.constant 0 : index
    %c0_7 = arith.constant 0 : index
    %c0_8 = arith.constant 0 : index
    %6 = vector.load %arg2[%c0_6, %c0_7, %c0_8] : memref<1x64x128xf32, #tpu.memory_space<vmem>>, vector<1x32x128xf32>
    %7 = vector.shape_cast %6 : vector<1x32x128xf32> to vector<32x128xf32>
    %cst = arith.constant dense<0.000000e+00> : vector<64x128xf32>
    %8 = tpu.matmul %5, %7, %cst {dimension_numbers = #tpu.dot_dimension_numbers<[1], [0], [0], [1], [0, 0, 1, 1], [], []>} : vector<64x32xf32>, vector<32x128xf32>, vector<64x128xf32> -> vector<64x128xf32>
    %9 = vector.broadcast %2 : vector<1x128xf32> to vector<64x128xf32>
    %10 = arith.addf %9, %8 : vector<64x128xf32>
    %11 = vector.extract_strided_slice %0 {offsets = [1, 0, 0, 0], sizes = [1, 8, 8, 32], strides = [1, 1, 1, 1]} : vector<2x8x8x32xf32> to vector<1x8x8x32xf32>
    %12 = vector.shape_cast %11 : vector<1x8x8x32xf32> to vector<8x8x32xf32>
    %13 = vector.shape_cast %12 : vector<8x8x32xf32> to vector<64x32xf32>
    %c0_9 = arith.constant 0 : index
    %c32 = arith.constant 32 : index
    %c0_10 = arith.constant 0 : index
    %14 = vector.load %arg2[%c0_9, %c32, %c0_10] : memref<1x64x128xf32, #tpu.memory_space<vmem>>, vector<1x32x128xf32>
    %15 = vector.shape_cast %14 : vector<1x32x128xf32> to vector<32x128xf32>
    %cst_11 = arith.constant dense<0.000000e+00> : vector<64x128xf32>
    %16 = tpu.matmul %13, %15, %cst_11 {dimension_numbers = #tpu.dot_dimension_numbers<[1], [0], [0], [1], [0, 0, 1, 1], [], []>} : vector<64x32xf32>, vector<32x128xf32>, vector<64x128xf32> -> vector<64x128xf32>
    %17 = arith.addf %10, %16 : vector<64x128xf32>
    %18 = vector.shape_cast %17 : vector<64x128xf32> to vector<8x8x128xf32>
    %c0_12 = arith.constant 0 : index
    %c0_13 = arith.constant 0 : index
    %c0_14 = arith.constant 0 : index
    %19 = vector.load %arg7[%c0_12, %c0_13, %c0_14] : memref<8x8x128xf32, #tpu.memory_space<vmem>>, vector<8x8x128xf32>
    tpu.vector_store %arg7[%c0_12, %c0_13, %c0_14], %18 {strides = array<i32>} : memref<8x8x128xf32, #tpu.memory_space<vmem>>, vector<8x8x128xf32>,
    %c0_i32 = arith.constant 0 : i32
    %20 = arith.cmpi eq, %arg0, %c0_i32 : i32
    %c0_i32_15 = arith.constant 0 : i32
    %c7_i32 = arith.constant 7 : i32
    %21 = arith.select %20, %c0_i32_15, %c7_i32 : i32
    %c0_i32_16 = arith.constant 0 : i32
    %22 = arith.cmpi eq, %arg0, %c0_i32_16 : i32
    %c1_i32 = arith.constant 1 : i32
    %c-1_i32 = arith.constant -1 : i32
    %23 = arith.select %22, %c1_i32, %c-1_i32 : i32
    %c0_17 = arith.constant 0 : index
    %c0_18 = arith.constant 0 : index
    %c0_19 = arith.constant 0 : index
    %24 = vector.load %arg3[%c0_17, %c0_18, %c0_19] : memref<1x32x128xf32, #tpu.memory_space<vmem>>, vector<1x32x128xf32>
    %25 = vector.shape_cast %24 : vector<1x32x128xf32> to vector<32x128xf32>
    %26 = tpu.iota {dimensions = array<i32: 1>} : vector<8x128xi32>
    %c64_i32 = arith.constant 64 : i32
    %27 = vector.broadcast %c64_i32 : i32 to vector<8x128xi32>
    %28 = arith.cmpi sge, %26, %27 : vector<8x128xi32>
    %c96_i32 = arith.constant 96 : i32
    %29 = vector.broadcast %c96_i32 : i32 to vector<8x128xi32>
    %30 = arith.cmpi slt, %26, %29 : vector<8x128xi32>
    %31 = arith.andi %28, %30 : vector<8x128xi1>
    %cst_20 = arith.constant 0.000000e+00 : f32
    %32 = vector.broadcast %cst_20 : f32 to vector<8x32xf32>
    %cst_21 = arith.constant 0.000000e+00 : f32
    %33 = vector.broadcast %cst_21 : f32 to vector<8x32xf32>
    %c0_i32_22 = arith.constant 0 : i32
    %c0_i32_23 = arith.constant 0 : i32
    %34 = arith.muli %23, %c0_i32_23 : i32
    %35 = arith.addi %21, %34 : i32
    %36 = arith.index_cast %35 : i32 to index
    %c0_24 = arith.constant 0 : index
    %c0_25 = arith.constant 0 : index
    %37 = vector.load %arg7[%36, %c0_24, %c0_25] : memref<8x8x128xf32, #tpu.memory_space<vmem>>, vector<1x8x128xf32>
    %38 = vector.shape_cast %37 : vector<1x8x128xf32> to vector<8x128xf32>
    %cst_26 = arith.constant dense<0.000000e+00> : vector<8x128xf32>
    %39 = tpu.matmul %32, %25, %cst_26 {dimension_numbers = #tpu.dot_dimension_numbers<[1], [0], [0], [1], [0, 0, 1, 1], [], []>} : vector<8x32xf32>, vector<32x128xf32>, vector<8x128xf32> -> vector<8x128xf32>
    %40 = arith.addf %38, %39 : vector<8x128xf32>
    %41 = math.tanh %40 : vector<8x128xf32>
    %42 = arith.negf %40 : vector<8x128xf32>
    %43 = math.exp %42 : vector<8x128xf32>
    %cst_27 = arith.constant 1.000000e+00 : f32
    %44 = vector.broadcast %cst_27 : f32 to vector<8x128xf32>
    %45 = arith.addf %44, %43 : vector<8x128xf32>
    %46 = arith.divf %44, %45 : vector<8x128xf32>
    %47 = arith.select %31, %41, %46 : vector<8x128xi1>, vector<8x128xf32>
    %48 = vector.extract_strided_slice %47 {offsets = [0, 0], sizes = [8, 32], strides = [1, 1]} : vector<8x128xf32> to vector<8x32xf32>
    %49 = vector.extract_strided_slice %47 {offsets = [0, 32], sizes = [8, 32], strides = [1, 1]} : vector<8x128xf32> to vector<8x32xf32>
    %50 = vector.extract_strided_slice %47 {offsets = [0, 64], sizes = [8, 32], strides = [1, 1]} : vector<8x128xf32> to vector<8x32xf32>
    %51 = vector.extract_strided_slice %47 {offsets = [0, 96], sizes = [8, 32], strides = [1, 1]} : vector<8x128xf32> to vector<8x32xf32>
    %52 = arith.mulf %49, %33 : vector<8x32xf32>
    %53 = arith.mulf %48, %50 : vector<8x32xf32>
    %54 = arith.addf %52, %53 : vector<8x32xf32>
    %55 = math.tanh %54 : vector<8x32xf32>
    %56 = arith.mulf %51, %55 : vector<8x32xf32>
    %c0_i32_28 = arith.constant 0 : i32
    %c0_i32_29 = arith.constant 0 : i32
    %c0_i32_30 = arith.constant 0 : i32
    %57 = tpu.memref_slice %arg5[%c0_i32_22, %c0_i32_28, %c0_i32_29, %c0_i32_30] : memref<1x8x8x32xf32, #tpu.memory_space<vmem>> -> memref<1x8x8x32xf32, #tpu.memory_space<vmem>>
    %58 = tpu.memref_squeeze %57 : memref<1x8x8x32xf32, #tpu.memory_space<vmem>> -> memref<8x8x32xf32, #tpu.memory_space<vmem>>
    %59 = arith.index_cast %35 : i32 to index
    %c0_31 = arith.constant 0 : index
    %c0_32 = arith.constant 0 : index
    %60 = vector.load %58[%59, %c0_31, %c0_32] : memref<8x8x32xf32, #tpu.memory_space<vmem>>, vector<1x8x32xf32>
    %61 = vector.shape_cast %60 : vector<1x8x32xf32> to vector<8x32xf32>
    %62 = vector.shape_cast %56 : vector<8x32xf32> to vector<1x8x32xf32>
    tpu.vector_store %58[%59, %c0_31, %c0_32], %62 {strides = array<i32>} : memref<8x8x32xf32, #tpu.memory_space<vmem>>, vector<1x8x32xf32>,
    %c1_i32_33 = arith.constant 1 : i32
    %63 = arith.muli %23, %c1_i32_33 : i32
    %64 = arith.addi %21, %63 : i32
    %65 = arith.index_cast %64 : i32 to index
    %c0_34 = arith.constant 0 : index
    %c0_35 = arith.constant 0 : index
    %66 = vector.load %arg7[%65, %c0_34, %c0_35] : memref<8x8x128xf32, #tpu.memory_space<vmem>>, vector<1x8x128xf32>
    %67 = vector.shape_cast %66 : vector<1x8x128xf32> to vector<8x128xf32>
    %cst_36 = arith.constant dense<0.000000e+00> : vector<8x128xf32>
    %68 = tpu.matmul %56, %25, %cst_36 {dimension_numbers = #tpu.dot_dimension_numbers<[1], [0], [0], [1], [0, 0, 1, 1], [], []>} : vector<8x32xf32>, vector<32x128xf32>, vector<8x128xf32> -> vector<8x128xf32>
    %69 = arith.addf %67, %68 : vector<8x128xf32>
    %70 = math.tanh %69 : vector<8x128xf32>
    %71 = arith.negf %69 : vector<8x128xf32>
    %72 = math.exp %71 : vector<8x128xf32>
    %cst_37 = arith.constant 1.000000e+00 : f32
    %73 = vector.broadcast %cst_37 : f32 to vector<8x128xf32>
    %74 = arith.addf %73, %72 : vector<8x128xf32>
    %75 = arith.divf %73, %74 : vector<8x128xf32>
    %76 = arith.select %31, %70, %75 : vector<8x128xi1>, vector<8x128xf32>
    %77 = vector.extract_strided_slice %76 {offsets = [0, 0], sizes = [8, 32], strides = [1, 1]} : vector<8x128xf32> to vector<8x32xf32>
    %78 = vector.extract_strided_slice %76 {offsets = [0, 32], sizes = [8, 32], strides = [1, 1]} : vector<8x128xf32> to vector<8x32xf32>
    %79 = vector.extract_strided_slice %76 {offsets = [0, 64], sizes = [8, 32], strides = [1, 1]} : vector<8x128xf32> to vector<8x32xf32>
    %80 = vector.extract_strided_slice %76 {offsets = [0, 96], sizes = [8, 32], strides = [1, 1]} : vector<8x128xf32> to vector<8x32xf32>
    %81 = arith.mulf %78, %54 : vector<8x32xf32>
    %82 = arith.mulf %77, %79 : vector<8x32xf32>
    %83 = arith.addf %81, %82 : vector<8x32xf32>
    %84 = math.tanh %83 : vector<8x32xf32>
    %85 = arith.mulf %80, %84 : vector<8x32xf32>
    %c0_i32_38 = arith.constant 0 : i32
    %c0_i32_39 = arith.constant 0 : i32
    %c0_i32_40 = arith.constant 0 : i32
    %86 = tpu.memref_slice %arg5[%c0_i32_22, %c0_i32_38, %c0_i32_39, %c0_i32_40] : memref<1x8x8x32xf32, #tpu.memory_space<vmem>> -> memref<1x8x8x32xf32, #tpu.memory_space<vmem>>
    %87 = tpu.memref_squeeze %86 : memref<1x8x8x32xf32, #tpu.memory_space<vmem>> -> memref<8x8x32xf32, #tpu.memory_space<vmem>>
    %88 = arith.index_cast %64 : i32 to index
    %c0_41 = arith.constant 0 : index
    %c0_42 = arith.constant 0 : index
    %89 = vector.load %87[%88, %c0_41, %c0_42] : memref<8x8x32xf32, #tpu.memory_space<vmem>>, vector<1x8x32xf32>
    %90 = vector.shape_cast %89 : vector<1x8x32xf32> to vector<8x32xf32>
    %91 = vector.shape_cast %85 : vector<8x32xf32> to vector<1x8x32xf32>
    tpu.vector_store %87[%88, %c0_41, %c0_42], %91 {strides = array<i32>} : memref<8x8x32xf32, #tpu.memory_space<vmem>>, vector<1x8x32xf32>,
    %c2_i32 = arith.constant 2 : i32
    %92 = arith.muli %23, %c2_i32 : i32
    %93 = arith.addi %21, %92 : i32
    %94 = arith.index_cast %93 : i32 to index
    %c0_43 = arith.constant 0 : index
    %c0_44 = arith.constant 0 : index
    %95 = vector.load %arg7[%94, %c0_43, %c0_44] : memref<8x8x128xf32, #tpu.memory_space<vmem>>, vector<1x8x128xf32>
    %96 = vector.shape_cast %95 : vector<1x8x128xf32> to vector<8x128xf32>
    %cst_45 = arith.constant dense<0.000000e+00> : vector<8x128xf32>
    %97 = tpu.matmul %85, %25, %cst_45 {dimension_numbers = #tpu.dot_dimension_numbers<[1], [0], [0], [1], [0, 0, 1, 1], [], []>} : vector<8x32xf32>, vector<32x128xf32>, vector<8x128xf32> -> vector<8x128xf32>
    %98 = arith.addf %96, %97 : vector<8x128xf32>
    %99 = math.tanh %98 : vector<8x128xf32>
    %100 = arith.negf %98 : vector<8x128xf32>
    %101 = math.exp %100 : vector<8x128xf32>
    %cst_46 = arith.constant 1.000000e+00 : f32
    %102 = vector.broadcast %cst_46 : f32 to vector<8x128xf32>
    %103 = arith.addf %102, %101 : vector<8x128xf32>
    %104 = arith.divf %102, %103 : vector<8x128xf32>
    %105 = arith.select %31, %99, %104 : vector<8x128xi1>, vector<8x128xf32>
    %106 = vector.extract_strided_slice %105 {offsets = [0, 0], sizes = [8, 32], strides = [1, 1]} : vector<8x128xf32> to vector<8x32xf32>
    %107 = vector.extract_strided_slice %105 {offsets = [0, 32], sizes = [8, 32], strides = [1, 1]} : vector<8x128xf32> to vector<8x32xf32>
    %108 = vector.extract_strided_slice %105 {offsets = [0, 64], sizes = [8, 32], strides = [1, 1]} : vector<8x128xf32> to vector<8x32xf32>
    %109 = vector.extract_strided_slice %105 {offsets = [0, 96], sizes = [8, 32], strides = [1, 1]} : vector<8x128xf32> to vector<8x32xf32>
    %110 = arith.mulf %107, %83 : vector<8x32xf32>
    %111 = arith.mulf %106, %108 : vector<8x32xf32>
    %112 = arith.addf %110, %111 : vector<8x32xf32>
    %113 = math.tanh %112 : vector<8x32xf32>
    %114 = arith.mulf %109, %113 : vector<8x32xf32>
    %c0_i32_47 = arith.constant 0 : i32
    %c0_i32_48 = arith.constant 0 : i32
    %c0_i32_49 = arith.constant 0 : i32
    %115 = tpu.memref_slice %arg5[%c0_i32_22, %c0_i32_47, %c0_i32_48, %c0_i32_49] : memref<1x8x8x32xf32, #tpu.memory_space<vmem>> -> memref<1x8x8x32xf32, #tpu.memory_space<vmem>>
    %116 = tpu.memref_squeeze %115 : memref<1x8x8x32xf32, #tpu.memory_space<vmem>> -> memref<8x8x32xf32, #tpu.memory_space<vmem>>
    %117 = arith.index_cast %93 : i32 to index
    %c0_50 = arith.constant 0 : index
    %c0_51 = arith.constant 0 : index
    %118 = vector.load %116[%117, %c0_50, %c0_51] : memref<8x8x32xf32, #tpu.memory_space<vmem>>, vector<1x8x32xf32>
    %119 = vector.shape_cast %118 : vector<1x8x32xf32> to vector<8x32xf32>
    %120 = vector.shape_cast %114 : vector<8x32xf32> to vector<1x8x32xf32>
    tpu.vector_store %116[%117, %c0_50, %c0_51], %120 {strides = array<i32>} : memref<8x8x32xf32, #tpu.memory_space<vmem>>, vector<1x8x32xf32>,
    %c3_i32 = arith.constant 3 : i32
    %121 = arith.muli %23, %c3_i32 : i32
    %122 = arith.addi %21, %121 : i32
    %123 = arith.index_cast %122 : i32 to index
    %c0_52 = arith.constant 0 : index
    %c0_53 = arith.constant 0 : index
    %124 = vector.load %arg7[%123, %c0_52, %c0_53] : memref<8x8x128xf32, #tpu.memory_space<vmem>>, vector<1x8x128xf32>
    %125 = vector.shape_cast %124 : vector<1x8x128xf32> to vector<8x128xf32>
    %cst_54 = arith.constant dense<0.000000e+00> : vector<8x128xf32>
    %126 = tpu.matmul %114, %25, %cst_54 {dimension_numbers = #tpu.dot_dimension_numbers<[1], [0], [0], [1], [0, 0, 1, 1], [], []>} : vector<8x32xf32>, vector<32x128xf32>, vector<8x128xf32> -> vector<8x128xf32>
    %127 = arith.addf %125, %126 : vector<8x128xf32>
    %128 = math.tanh %127 : vector<8x128xf32>
    %129 = arith.negf %127 : vector<8x128xf32>
    %130 = math.exp %129 : vector<8x128xf32>
    %cst_55 = arith.constant 1.000000e+00 : f32
    %131 = vector.broadcast %cst_55 : f32 to vector<8x128xf32>
    %132 = arith.addf %131, %130 : vector<8x128xf32>
    %133 = arith.divf %131, %132 : vector<8x128xf32>
    %134 = arith.select %31, %128, %133 : vector<8x128xi1>, vector<8x128xf32>
    %135 = vector.extract_strided_slice %134 {offsets = [0, 0], sizes = [8, 32], strides = [1, 1]} : vector<8x128xf32> to vector<8x32xf32>
    %136 = vector.extract_strided_slice %134 {offsets = [0, 32], sizes = [8, 32], strides = [1, 1]} : vector<8x128xf32> to vector<8x32xf32>
    %137 = vector.extract_strided_slice %134 {offsets = [0, 64], sizes = [8, 32], strides = [1, 1]} : vector<8x128xf32> to vector<8x32xf32>
    %138 = vector.extract_strided_slice %134 {offsets = [0, 96], sizes = [8, 32], strides = [1, 1]} : vector<8x128xf32> to vector<8x32xf32>
    %139 = arith.mulf %136, %112 : vector<8x32xf32>
    %140 = arith.mulf %135, %137 : vector<8x32xf32>
    %141 = arith.addf %139, %140 : vector<8x32xf32>
    %142 = math.tanh %141 : vector<8x32xf32>
    %143 = arith.mulf %138, %142 : vector<8x32xf32>
    %c0_i32_56 = arith.constant 0 : i32
    %c0_i32_57 = arith.constant 0 : i32
    %c0_i32_58 = arith.constant 0 : i32
    %144 = tpu.memref_slice %arg5[%c0_i32_22, %c0_i32_56, %c0_i32_57, %c0_i32_58] : memref<1x8x8x32xf32, #tpu.memory_space<vmem>> -> memref<1x8x8x32xf32, #tpu.memory_space<vmem>>
    %145 = tpu.memref_squeeze %144 : memref<1x8x8x32xf32, #tpu.memory_space<vmem>> -> memref<8x8x32xf32, #tpu.memory_space<vmem>>
    %146 = arith.index_cast %122 : i32 to index
    %c0_59 = arith.constant 0 : index
    %c0_60 = arith.constant 0 : index
    %147 = vector.load %145[%146, %c0_59, %c0_60] : memref<8x8x32xf32, #tpu.memory_space<vmem>>, vector<1x8x32xf32>
    %148 = vector.shape_cast %147 : vector<1x8x32xf32> to vector<8x32xf32>
    %149 = vector.shape_cast %143 : vector<8x32xf32> to vector<1x8x32xf32>
    tpu.vector_store %145[%146, %c0_59, %c0_60], %149 {strides = array<i32>} : memref<8x8x32xf32, #tpu.memory_space<vmem>>, vector<1x8x32xf32>,
    %c4_i32 = arith.constant 4 : i32
    %150 = arith.muli %23, %c4_i32 : i32
    %151 = arith.addi %21, %150 : i32
    %152 = arith.index_cast %151 : i32 to index
    %c0_61 = arith.constant 0 : index
    %c0_62 = arith.constant 0 : index
    %153 = vector.load %arg7[%152, %c0_61, %c0_62] : memref<8x8x128xf32, #tpu.memory_space<vmem>>, vector<1x8x128xf32>
    %154 = vector.shape_cast %153 : vector<1x8x128xf32> to vector<8x128xf32>
    %cst_63 = arith.constant dense<0.000000e+00> : vector<8x128xf32>
    %155 = tpu.matmul %143, %25, %cst_63 {dimension_numbers = #tpu.dot_dimension_numbers<[1], [0], [0], [1], [0, 0, 1, 1], [], []>} : vector<8x32xf32>, vector<32x128xf32>, vector<8x128xf32> -> vector<8x128xf32>
    %156 = arith.addf %154, %155 : vector<8x128xf32>
    %157 = math.tanh %156 : vector<8x128xf32>
    %158 = arith.negf %156 : vector<8x128xf32>
    %159 = math.exp %158 : vector<8x128xf32>
    %cst_64 = arith.constant 1.000000e+00 : f32
    %160 = vector.broadcast %cst_64 : f32 to vector<8x128xf32>
    %161 = arith.addf %160, %159 : vector<8x128xf32>
    %162 = arith.divf %160, %161 : vector<8x128xf32>
    %163 = arith.select %31, %157, %162 : vector<8x128xi1>, vector<8x128xf32>
    %164 = vector.extract_strided_slice %163 {offsets = [0, 0], sizes = [8, 32], strides = [1, 1]} : vector<8x128xf32> to vector<8x32xf32>
    %165 = vector.extract_strided_slice %163 {offsets = [0, 32], sizes = [8, 32], strides = [1, 1]} : vector<8x128xf32> to vector<8x32xf32>
    %166 = vector.extract_strided_slice %163 {offsets = [0, 64], sizes = [8, 32], strides = [1, 1]} : vector<8x128xf32> to vector<8x32xf32>
    %167 = vector.extract_strided_slice %163 {offsets = [0, 96], sizes = [8, 32], strides = [1, 1]} : vector<8x128xf32> to vector<8x32xf32>
    %168 = arith.mulf %165, %141 : vector<8x32xf32>
    %169 = arith.mulf %164, %166 : vector<8x32xf32>
    %170 = arith.addf %168, %169 : vector<8x32xf32>
    %171 = math.tanh %170 : vector<8x32xf32>
    %172 = arith.mulf %167, %171 : vector<8x32xf32>
    %c0_i32_65 = arith.constant 0 : i32
    %c0_i32_66 = arith.constant 0 : i32
    %c0_i32_67 = arith.constant 0 : i32
    %173 = tpu.memref_slice %arg5[%c0_i32_22, %c0_i32_65, %c0_i32_66, %c0_i32_67] : memref<1x8x8x32xf32, #tpu.memory_space<vmem>> -> memref<1x8x8x32xf32, #tpu.memory_space<vmem>>
    %174 = tpu.memref_squeeze %173 : memref<1x8x8x32xf32, #tpu.memory_space<vmem>> -> memref<8x8x32xf32, #tpu.memory_space<vmem>>
    %175 = arith.index_cast %151 : i32 to index
    %c0_68 = arith.constant 0 : index
    %c0_69 = arith.constant 0 : index
    %176 = vector.load %174[%175, %c0_68, %c0_69] : memref<8x8x32xf32, #tpu.memory_space<vmem>>, vector<1x8x32xf32>
    %177 = vector.shape_cast %176 : vector<1x8x32xf32> to vector<8x32xf32>
    %178 = vector.shape_cast %172 : vector<8x32xf32> to vector<1x8x32xf32>
    tpu.vector_store %174[%175, %c0_68, %c0_69], %178 {strides = array<i32>} : memref<8x8x32xf32, #tpu.memory_space<vmem>>, vector<1x8x32xf32>,
    %c5_i32 = arith.constant 5 : i32
    %179 = arith.muli %23, %c5_i32 : i32
    %180 = arith.addi %21, %179 : i32
    %181 = arith.index_cast %180 : i32 to index
    %c0_70 = arith.constant 0 : index
    %c0_71 = arith.constant 0 : index
    %182 = vector.load %arg7[%181, %c0_70, %c0_71] : memref<8x8x128xf32, #tpu.memory_space<vmem>>, vector<1x8x128xf32>
    %183 = vector.shape_cast %182 : vector<1x8x128xf32> to vector<8x128xf32>
    %cst_72 = arith.constant dense<0.000000e+00> : vector<8x128xf32>
    %184 = tpu.matmul %172, %25, %cst_72 {dimension_numbers = #tpu.dot_dimension_numbers<[1], [0], [0], [1], [0, 0, 1, 1], [], []>} : vector<8x32xf32>, vector<32x128xf32>, vector<8x128xf32> -> vector<8x128xf32>
    %185 = arith.addf %183, %184 : vector<8x128xf32>
    %186 = math.tanh %185 : vector<8x128xf32>
    %187 = arith.negf %185 : vector<8x128xf32>
    %188 = math.exp %187 : vector<8x128xf32>
    %cst_73 = arith.constant 1.000000e+00 : f32
    %189 = vector.broadcast %cst_73 : f32 to vector<8x128xf32>
    %190 = arith.addf %189, %188 : vector<8x128xf32>
    %191 = arith.divf %189, %190 : vector<8x128xf32>
    %192 = arith.select %31, %186, %191 : vector<8x128xi1>, vector<8x128xf32>
    %193 = vector.extract_strided_slice %192 {offsets = [0, 0], sizes = [8, 32], strides = [1, 1]} : vector<8x128xf32> to vector<8x32xf32>
    %194 = vector.extract_strided_slice %192 {offsets = [0, 32], sizes = [8, 32], strides = [1, 1]} : vector<8x128xf32> to vector<8x32xf32>
    %195 = vector.extract_strided_slice %192 {offsets = [0, 64], sizes = [8, 32], strides = [1, 1]} : vector<8x128xf32> to vector<8x32xf32>
    %196 = vector.extract_strided_slice %192 {offsets = [0, 96], sizes = [8, 32], strides = [1, 1]} : vector<8x128xf32> to vector<8x32xf32>
    %197 = arith.mulf %194, %170 : vector<8x32xf32>
    %198 = arith.mulf %193, %195 : vector<8x32xf32>
    %199 = arith.addf %197, %198 : vector<8x32xf32>
    %200 = math.tanh %199 : vector<8x32xf32>
    %201 = arith.mulf %196, %200 : vector<8x32xf32>
    %c0_i32_74 = arith.constant 0 : i32
    %c0_i32_75 = arith.constant 0 : i32
    %c0_i32_76 = arith.constant 0 : i32
    %202 = tpu.memref_slice %arg5[%c0_i32_22, %c0_i32_74, %c0_i32_75, %c0_i32_76] : memref<1x8x8x32xf32, #tpu.memory_space<vmem>> -> memref<1x8x8x32xf32, #tpu.memory_space<vmem>>
    %203 = tpu.memref_squeeze %202 : memref<1x8x8x32xf32, #tpu.memory_space<vmem>> -> memref<8x8x32xf32, #tpu.memory_space<vmem>>
    %204 = arith.index_cast %180 : i32 to index
    %c0_77 = arith.constant 0 : index
    %c0_78 = arith.constant 0 : index
    %205 = vector.load %203[%204, %c0_77, %c0_78] : memref<8x8x32xf32, #tpu.memory_space<vmem>>, vector<1x8x32xf32>
    %206 = vector.shape_cast %205 : vector<1x8x32xf32> to vector<8x32xf32>
    %207 = vector.shape_cast %201 : vector<8x32xf32> to vector<1x8x32xf32>
    tpu.vector_store %203[%204, %c0_77, %c0_78], %207 {strides = array<i32>} : memref<8x8x32xf32, #tpu.memory_space<vmem>>, vector<1x8x32xf32>,
    %c6_i32 = arith.constant 6 : i32
    %208 = arith.muli %23, %c6_i32 : i32
    %209 = arith.addi %21, %208 : i32
    %210 = arith.index_cast %209 : i32 to index
    %c0_79 = arith.constant 0 : index
    %c0_80 = arith.constant 0 : index
    %211 = vector.load %arg7[%210, %c0_79, %c0_80] : memref<8x8x128xf32, #tpu.memory_space<vmem>>, vector<1x8x128xf32>
    %212 = vector.shape_cast %211 : vector<1x8x128xf32> to vector<8x128xf32>
    %cst_81 = arith.constant dense<0.000000e+00> : vector<8x128xf32>
    %213 = tpu.matmul %201, %25, %cst_81 {dimension_numbers = #tpu.dot_dimension_numbers<[1], [0], [0], [1], [0, 0, 1, 1], [], []>} : vector<8x32xf32>, vector<32x128xf32>, vector<8x128xf32> -> vector<8x128xf32>
    %214 = arith.addf %212, %213 : vector<8x128xf32>
    %215 = math.tanh %214 : vector<8x128xf32>
    %216 = arith.negf %214 : vector<8x128xf32>
    %217 = math.exp %216 : vector<8x128xf32>
    %cst_82 = arith.constant 1.000000e+00 : f32
    %218 = vector.broadcast %cst_82 : f32 to vector<8x128xf32>
    %219 = arith.addf %218, %217 : vector<8x128xf32>
    %220 = arith.divf %218, %219 : vector<8x128xf32>
    %221 = arith.select %31, %215, %220 : vector<8x128xi1>, vector<8x128xf32>
    %222 = vector.extract_strided_slice %221 {offsets = [0, 0], sizes = [8, 32], strides = [1, 1]} : vector<8x128xf32> to vector<8x32xf32>
    %223 = vector.extract_strided_slice %221 {offsets = [0, 32], sizes = [8, 32], strides = [1, 1]} : vector<8x128xf32> to vector<8x32xf32>
    %224 = vector.extract_strided_slice %221 {offsets = [0, 64], sizes = [8, 32], strides = [1, 1]} : vector<8x128xf32> to vector<8x32xf32>
    %225 = vector.extract_strided_slice %221 {offsets = [0, 96], sizes = [8, 32], strides = [1, 1]} : vector<8x128xf32> to vector<8x32xf32>
    %226 = arith.mulf %223, %199 : vector<8x32xf32>
    %227 = arith.mulf %222, %224 : vector<8x32xf32>
    %228 = arith.addf %226, %227 : vector<8x32xf32>
    %229 = math.tanh %228 : vector<8x32xf32>
    %230 = arith.mulf %225, %229 : vector<8x32xf32>
    %c0_i32_83 = arith.constant 0 : i32
    %c0_i32_84 = arith.constant 0 : i32
    %c0_i32_85 = arith.constant 0 : i32
    %231 = tpu.memref_slice %arg5[%c0_i32_22, %c0_i32_83, %c0_i32_84, %c0_i32_85] : memref<1x8x8x32xf32, #tpu.memory_space<vmem>> -> memref<1x8x8x32xf32, #tpu.memory_space<vmem>>
    %232 = tpu.memref_squeeze %231 : memref<1x8x8x32xf32, #tpu.memory_space<vmem>> -> memref<8x8x32xf32, #tpu.memory_space<vmem>>
    %233 = arith.index_cast %209 : i32 to index
    %c0_86 = arith.constant 0 : index
    %c0_87 = arith.constant 0 : index
    %234 = vector.load %232[%233, %c0_86, %c0_87] : memref<8x8x32xf32, #tpu.memory_space<vmem>>, vector<1x8x32xf32>
    %235 = vector.shape_cast %234 : vector<1x8x32xf32> to vector<8x32xf32>
    %236 = vector.shape_cast %230 : vector<8x32xf32> to vector<1x8x32xf32>
    tpu.vector_store %232[%233, %c0_86, %c0_87], %236 {strides = array<i32>} : memref<8x8x32xf32, #tpu.memory_space<vmem>>, vector<1x8x32xf32>,
    %c7_i32_88 = arith.constant 7 : i32
    %237 = arith.muli %23, %c7_i32_88 : i32
    %238 = arith.addi %21, %237 : i32
    %239 = arith.index_cast %238 : i32 to index
    %c0_89 = arith.constant 0 : index
    %c0_90 = arith.constant 0 : index
    %240 = vector.load %arg7[%239, %c0_89, %c0_90] : memref<8x8x128xf32, #tpu.memory_space<vmem>>, vector<1x8x128xf32>
    %241 = vector.shape_cast %240 : vector<1x8x128xf32> to vector<8x128xf32>
    %cst_91 = arith.constant dense<0.000000e+00> : vector<8x128xf32>
    %242 = tpu.matmul %230, %25, %cst_91 {dimension_numbers = #tpu.dot_dimension_numbers<[1], [0], [0], [1], [0, 0, 1, 1], [], []>} : vector<8x32xf32>, vector<32x128xf32>, vector<8x128xf32> -> vector<8x128xf32>
    %243 = arith.addf %241, %242 : vector<8x128xf32>
    %244 = math.tanh %243 : vector<8x128xf32>
    %245 = arith.negf %243 : vector<8x128xf32>
    %246 = math.exp %245 : vector<8x128xf32>
    %cst_92 = arith.constant 1.000000e+00 : f32
    %247 = vector.broadcast %cst_92 : f32 to vector<8x128xf32>
    %248 = arith.addf %247, %246 : vector<8x128xf32>
    %249 = arith.divf %247, %248 : vector<8x128xf32>
    %250 = arith.select %31, %244, %249 : vector<8x128xi1>, vector<8x128xf32>
    %251 = vector.extract_strided_slice %250 {offsets = [0, 0], sizes = [8, 32], strides = [1, 1]} : vector<8x128xf32> to vector<8x32xf32>
    %252 = vector.extract_strided_slice %250 {offsets = [0, 32], sizes = [8, 32], strides = [1, 1]} : vector<8x128xf32> to vector<8x32xf32>
    %253 = vector.extract_strided_slice %250 {offsets = [0, 64], sizes = [8, 32], strides = [1, 1]} : vector<8x128xf32> to vector<8x32xf32>
    %254 = vector.extract_strided_slice %250 {offsets = [0, 96], sizes = [8, 32], strides = [1, 1]} : vector<8x128xf32> to vector<8x32xf32>
    %255 = arith.mulf %252, %228 : vector<8x32xf32>
    %256 = arith.mulf %251, %253 : vector<8x32xf32>
    %257 = arith.addf %255, %256 : vector<8x32xf32>
    %258 = math.tanh %257 : vector<8x32xf32>
    %259 = arith.mulf %254, %258 : vector<8x32xf32>
    %c0_i32_93 = arith.constant 0 : i32
    %c0_i32_94 = arith.constant 0 : i32
    %c0_i32_95 = arith.constant 0 : i32
    %260 = tpu.memref_slice %arg5[%c0_i32_22, %c0_i32_93, %c0_i32_94, %c0_i32_95] : memref<1x8x8x32xf32, #tpu.memory_space<vmem>> -> memref<1x8x8x32xf32, #tpu.memory_space<vmem>>
    %261 = tpu.memref_squeeze %260 : memref<1x8x8x32xf32, #tpu.memory_space<vmem>> -> memref<8x8x32xf32, #tpu.memory_space<vmem>>
    %262 = arith.index_cast %238 : i32 to index
    %c0_96 = arith.constant 0 : index
    %c0_97 = arith.constant 0 : index
    %263 = vector.load %261[%262, %c0_96, %c0_97] : memref<8x8x32xf32, #tpu.memory_space<vmem>>, vector<1x8x32xf32>
    %264 = vector.shape_cast %263 : vector<1x8x32xf32> to vector<8x32xf32>
    %265 = vector.shape_cast %259 : vector<8x32xf32> to vector<1x8x32xf32>
    tpu.vector_store %261[%262, %c0_96, %c0_97], %265 {strides = array<i32>} : memref<8x8x32xf32, #tpu.memory_space<vmem>>, vector<1x8x32xf32>,
    %c8_i32 = arith.constant 8 : i32
    %c0_98 = arith.constant 0 : index
    %c0_99 = arith.constant 0 : index
    %c0_100 = arith.constant 0 : index
    %266 = vector.load %arg6[%c0_98, %c0_99, %c0_100] : memref<1x8x32xf32, #tpu.memory_space<vmem>>, vector<1x8x32xf32>
    %267 = vector.shape_cast %266 : vector<1x8x32xf32> to vector<8x32xf32>
    %268 = vector.shape_cast %259 : vector<8x32xf32> to vector<1x8x32xf32>
    tpu.vector_store %arg6[%c0_98, %c0_99, %c0_100], %268 {strides = array<i32>} : memref<1x8x32xf32, #tpu.memory_space<vmem>>, vector<1x8x32xf32>,
    return
  }
  func.func @transform_0(%arg0: i32) -> (i32, i32, i32, i32) {
    %c0_i32 = arith.constant 0 : i32
    %c0_i32_0 = arith.constant 0 : i32
    %c0_i32_1 = arith.constant 0 : i32
    %c0_i32_2 = arith.constant 0 : i32
    %c0_i32_3 = arith.constant 0 : i32
    return %c0_i32, %c0_i32_0, %c0_i32_1, %c0_i32_2 : i32, i32, i32, i32
  }
  func.func @transform_1(%arg0: i32) -> (i32, i32, i32) {
    %c0_i32 = arith.constant 0 : i32
    %c0_i32_0 = arith.constant 0 : i32
    %c0_i32_1 = arith.constant 0 : i32
    return %arg0, %c0_i32, %c0_i32_0 : i32, i32, i32
  }
  func.func @transform_2(%arg0: i32) -> (i32, i32, i32) {
    %c0_i32 = arith.constant 0 : i32
    %c0_i32_0 = arith.constant 0 : i32
    %c0_i32_1 = arith.constant 0 : i32
    return %arg0, %c0_i32, %c0_i32_0 : i32, i32, i32
  }
  func.func @transform_3(%arg0: i32) -> (i32, i32, i32) {
    %c0_i32 = arith.constant 0 : i32
    %c0_i32_0 = arith.constant 0 : i32
    %c0_i32_1 = arith.constant 0 : i32
    return %arg0, %c0_i32, %c0_i32_0 : i32, i32, i32
  }
  func.func @transform_4(%arg0: i32) -> (i32, i32, i32, i32) {
    %c0_i32 = arith.constant 0 : i32
    %c0_i32_0 = arith.constant 0 : i32
    %c0_i32_1 = arith.constant 0 : i32
    %c0_i32_2 = arith.constant 0 : i32
    return %arg0, %c0_i32, %c0_i32_0, %c0_i32_1 : i32, i32, i32, i32
  }
  func.func @transform_5(%arg0: i32) -> (i32, i32, i32) {
    %c0_i32 = arith.constant 0 : i32
    %c0_i32_0 = arith.constant 0 : i32
    %c0_i32_1 = arith.constant 0 : i32
    return %arg0, %c0_i32, %c0_i32_0 : i32, i32, i32
  }
}

module attributes {stable_mosaic.version = 11 : i64} {
  func.func @_bilstm_layer_kernel(%arg0: i32, %arg1: memref<1x8x8x16xf32, #tpu.memory_space<vmem>>, %arg2: memref<1x16x128xf32, #tpu.memory_space<vmem>>, %arg3: memref<1x32x128xf32, #tpu.memory_space<vmem>>, %arg4: memref<1x1x128xf32, #tpu.memory_space<vmem>>, %arg5: memref<1x8x8x32xf32, #tpu.memory_space<vmem>>, %arg6: memref<1x8x32xf32, #tpu.memory_space<vmem>>, %arg7: memref<8x8x128xf32, #tpu.memory_space<vmem>>) attributes {dimension_semantics = [#tpu.dimension_semantics<parallel>], iteration_bounds = array<i64: 2>, scalar_prefetch = 0 : i64, scratch_operands = 1 : i64, tpu.core_type = #tpu.core_type<tc>, window_params = [{pipeline_mode = #tpu.pipeline_mode<synchronous>, transform_indices = @transform_0, window_bounds = array<i64: 1, 8, 8, 16>}, {transform_indices = @transform_1, window_bounds = array<i64: 1, 16, 128>}, {transform_indices = @transform_2, window_bounds = array<i64: 1, 32, 128>}, {transform_indices = @transform_3, window_bounds = array<i64: 1, 1, 128>}, {transform_indices = @transform_4, window_bounds = array<i64: 1, 8, 8, 32>}, {transform_indices = @transform_5, window_bounds = array<i64: 1, 8, 32>}]} {
    %c0 = arith.constant 0 : index
    %c0_0 = arith.constant 0 : index
    %c0_1 = arith.constant 0 : index
    %c0_2 = arith.constant 0 : index
    %0 = vector.load %arg1[%c0, %c0_0, %c0_1, %c0_2] : memref<1x8x8x16xf32, #tpu.memory_space<vmem>>, vector<1x8x8x16xf32>
    %c0_3 = arith.constant 0 : index
    %c0_4 = arith.constant 0 : index
    %c0_5 = arith.constant 0 : index
    %1 = vector.load %arg4[%c0_3, %c0_4, %c0_5] : memref<1x1x128xf32, #tpu.memory_space<vmem>>, vector<1x1x128xf32>
    %2 = vector.shape_cast %1 : vector<1x1x128xf32> to vector<1x128xf32>
    %3 = vector.shape_cast %0 : vector<1x8x8x16xf32> to vector<8x8x16xf32>
    %4 = vector.shape_cast %3 : vector<8x8x16xf32> to vector<64x16xf32>
    %c0_6 = arith.constant 0 : index
    %c0_7 = arith.constant 0 : index
    %c0_8 = arith.constant 0 : index
    %5 = vector.load %arg2[%c0_6, %c0_7, %c0_8] : memref<1x16x128xf32, #tpu.memory_space<vmem>>, vector<1x16x128xf32>
    %6 = vector.shape_cast %5 : vector<1x16x128xf32> to vector<16x128xf32>
    %cst = arith.constant dense<0.000000e+00> : vector<64x128xf32>
    %7 = tpu.matmul %4, %6, %cst {dimension_numbers = #tpu.dot_dimension_numbers<[1], [0], [0], [1], [0, 0, 1, 1], [], []>} : vector<64x16xf32>, vector<16x128xf32>, vector<64x128xf32> -> vector<64x128xf32>
    %8 = vector.broadcast %2 : vector<1x128xf32> to vector<64x128xf32>
    %9 = arith.addf %8, %7 : vector<64x128xf32>
    %10 = vector.shape_cast %9 : vector<64x128xf32> to vector<8x8x128xf32>
    %c0_9 = arith.constant 0 : index
    %c0_10 = arith.constant 0 : index
    %c0_11 = arith.constant 0 : index
    %11 = vector.load %arg7[%c0_9, %c0_10, %c0_11] : memref<8x8x128xf32, #tpu.memory_space<vmem>>, vector<8x8x128xf32>
    tpu.vector_store %arg7[%c0_9, %c0_10, %c0_11], %10 {strides = array<i32>} : memref<8x8x128xf32, #tpu.memory_space<vmem>>, vector<8x8x128xf32>,
    %c0_i32 = arith.constant 0 : i32
    %12 = arith.cmpi eq, %arg0, %c0_i32 : i32
    %c0_i32_12 = arith.constant 0 : i32
    %c7_i32 = arith.constant 7 : i32
    %13 = arith.select %12, %c0_i32_12, %c7_i32 : i32
    %c0_i32_13 = arith.constant 0 : i32
    %14 = arith.cmpi eq, %arg0, %c0_i32_13 : i32
    %c1_i32 = arith.constant 1 : i32
    %c-1_i32 = arith.constant -1 : i32
    %15 = arith.select %14, %c1_i32, %c-1_i32 : i32
    %c0_14 = arith.constant 0 : index
    %c0_15 = arith.constant 0 : index
    %c0_16 = arith.constant 0 : index
    %16 = vector.load %arg3[%c0_14, %c0_15, %c0_16] : memref<1x32x128xf32, #tpu.memory_space<vmem>>, vector<1x32x128xf32>
    %17 = vector.shape_cast %16 : vector<1x32x128xf32> to vector<32x128xf32>
    %18 = tpu.iota {dimensions = array<i32: 1>} : vector<8x128xi32>
    %c64_i32 = arith.constant 64 : i32
    %19 = vector.broadcast %c64_i32 : i32 to vector<8x128xi32>
    %20 = arith.cmpi sge, %18, %19 : vector<8x128xi32>
    %c96_i32 = arith.constant 96 : i32
    %21 = vector.broadcast %c96_i32 : i32 to vector<8x128xi32>
    %22 = arith.cmpi slt, %18, %21 : vector<8x128xi32>
    %23 = arith.andi %20, %22 : vector<8x128xi1>
    %cst_17 = arith.constant 0.000000e+00 : f32
    %24 = vector.broadcast %cst_17 : f32 to vector<8x32xf32>
    %cst_18 = arith.constant 0.000000e+00 : f32
    %25 = vector.broadcast %cst_18 : f32 to vector<8x32xf32>
    %c0_i32_19 = arith.constant 0 : i32
    %c0_i32_20 = arith.constant 0 : i32
    %26 = arith.muli %15, %c0_i32_20 : i32
    %27 = arith.addi %13, %26 : i32
    %28 = arith.index_cast %27 : i32 to index
    %c0_21 = arith.constant 0 : index
    %c0_22 = arith.constant 0 : index
    %29 = vector.load %arg7[%28, %c0_21, %c0_22] : memref<8x8x128xf32, #tpu.memory_space<vmem>>, vector<1x8x128xf32>
    %30 = vector.shape_cast %29 : vector<1x8x128xf32> to vector<8x128xf32>
    %cst_23 = arith.constant dense<0.000000e+00> : vector<8x128xf32>
    %31 = tpu.matmul %24, %17, %cst_23 {dimension_numbers = #tpu.dot_dimension_numbers<[1], [0], [0], [1], [0, 0, 1, 1], [], []>} : vector<8x32xf32>, vector<32x128xf32>, vector<8x128xf32> -> vector<8x128xf32>
    %32 = arith.addf %30, %31 : vector<8x128xf32>
    %33 = math.tanh %32 : vector<8x128xf32>
    %34 = arith.negf %32 : vector<8x128xf32>
    %35 = math.exp %34 : vector<8x128xf32>
    %cst_24 = arith.constant 1.000000e+00 : f32
    %36 = vector.broadcast %cst_24 : f32 to vector<8x128xf32>
    %37 = arith.addf %36, %35 : vector<8x128xf32>
    %38 = arith.divf %36, %37 : vector<8x128xf32>
    %39 = arith.select %23, %33, %38 : vector<8x128xi1>, vector<8x128xf32>
    %40 = vector.extract_strided_slice %39 {offsets = [0, 0], sizes = [8, 32], strides = [1, 1]} : vector<8x128xf32> to vector<8x32xf32>
    %41 = vector.extract_strided_slice %39 {offsets = [0, 32], sizes = [8, 32], strides = [1, 1]} : vector<8x128xf32> to vector<8x32xf32>
    %42 = vector.extract_strided_slice %39 {offsets = [0, 64], sizes = [8, 32], strides = [1, 1]} : vector<8x128xf32> to vector<8x32xf32>
    %43 = vector.extract_strided_slice %39 {offsets = [0, 96], sizes = [8, 32], strides = [1, 1]} : vector<8x128xf32> to vector<8x32xf32>
    %44 = arith.mulf %41, %25 : vector<8x32xf32>
    %45 = arith.mulf %40, %42 : vector<8x32xf32>
    %46 = arith.addf %44, %45 : vector<8x32xf32>
    %47 = math.tanh %46 : vector<8x32xf32>
    %48 = arith.mulf %43, %47 : vector<8x32xf32>
    %c0_i32_25 = arith.constant 0 : i32
    %c0_i32_26 = arith.constant 0 : i32
    %c0_i32_27 = arith.constant 0 : i32
    %49 = tpu.memref_slice %arg5[%c0_i32_19, %c0_i32_25, %c0_i32_26, %c0_i32_27] : memref<1x8x8x32xf32, #tpu.memory_space<vmem>> -> memref<1x8x8x32xf32, #tpu.memory_space<vmem>>
    %50 = tpu.memref_squeeze %49 : memref<1x8x8x32xf32, #tpu.memory_space<vmem>> -> memref<8x8x32xf32, #tpu.memory_space<vmem>>
    %51 = arith.index_cast %27 : i32 to index
    %c0_28 = arith.constant 0 : index
    %c0_29 = arith.constant 0 : index
    %52 = vector.load %50[%51, %c0_28, %c0_29] : memref<8x8x32xf32, #tpu.memory_space<vmem>>, vector<1x8x32xf32>
    %53 = vector.shape_cast %52 : vector<1x8x32xf32> to vector<8x32xf32>
    %54 = vector.shape_cast %48 : vector<8x32xf32> to vector<1x8x32xf32>
    tpu.vector_store %50[%51, %c0_28, %c0_29], %54 {strides = array<i32>} : memref<8x8x32xf32, #tpu.memory_space<vmem>>, vector<1x8x32xf32>,
    %c1_i32_30 = arith.constant 1 : i32
    %55 = arith.muli %15, %c1_i32_30 : i32
    %56 = arith.addi %13, %55 : i32
    %57 = arith.index_cast %56 : i32 to index
    %c0_31 = arith.constant 0 : index
    %c0_32 = arith.constant 0 : index
    %58 = vector.load %arg7[%57, %c0_31, %c0_32] : memref<8x8x128xf32, #tpu.memory_space<vmem>>, vector<1x8x128xf32>
    %59 = vector.shape_cast %58 : vector<1x8x128xf32> to vector<8x128xf32>
    %cst_33 = arith.constant dense<0.000000e+00> : vector<8x128xf32>
    %60 = tpu.matmul %48, %17, %cst_33 {dimension_numbers = #tpu.dot_dimension_numbers<[1], [0], [0], [1], [0, 0, 1, 1], [], []>} : vector<8x32xf32>, vector<32x128xf32>, vector<8x128xf32> -> vector<8x128xf32>
    %61 = arith.addf %59, %60 : vector<8x128xf32>
    %62 = math.tanh %61 : vector<8x128xf32>
    %63 = arith.negf %61 : vector<8x128xf32>
    %64 = math.exp %63 : vector<8x128xf32>
    %cst_34 = arith.constant 1.000000e+00 : f32
    %65 = vector.broadcast %cst_34 : f32 to vector<8x128xf32>
    %66 = arith.addf %65, %64 : vector<8x128xf32>
    %67 = arith.divf %65, %66 : vector<8x128xf32>
    %68 = arith.select %23, %62, %67 : vector<8x128xi1>, vector<8x128xf32>
    %69 = vector.extract_strided_slice %68 {offsets = [0, 0], sizes = [8, 32], strides = [1, 1]} : vector<8x128xf32> to vector<8x32xf32>
    %70 = vector.extract_strided_slice %68 {offsets = [0, 32], sizes = [8, 32], strides = [1, 1]} : vector<8x128xf32> to vector<8x32xf32>
    %71 = vector.extract_strided_slice %68 {offsets = [0, 64], sizes = [8, 32], strides = [1, 1]} : vector<8x128xf32> to vector<8x32xf32>
    %72 = vector.extract_strided_slice %68 {offsets = [0, 96], sizes = [8, 32], strides = [1, 1]} : vector<8x128xf32> to vector<8x32xf32>
    %73 = arith.mulf %70, %46 : vector<8x32xf32>
    %74 = arith.mulf %69, %71 : vector<8x32xf32>
    %75 = arith.addf %73, %74 : vector<8x32xf32>
    %76 = math.tanh %75 : vector<8x32xf32>
    %77 = arith.mulf %72, %76 : vector<8x32xf32>
    %c0_i32_35 = arith.constant 0 : i32
    %c0_i32_36 = arith.constant 0 : i32
    %c0_i32_37 = arith.constant 0 : i32
    %78 = tpu.memref_slice %arg5[%c0_i32_19, %c0_i32_35, %c0_i32_36, %c0_i32_37] : memref<1x8x8x32xf32, #tpu.memory_space<vmem>> -> memref<1x8x8x32xf32, #tpu.memory_space<vmem>>
    %79 = tpu.memref_squeeze %78 : memref<1x8x8x32xf32, #tpu.memory_space<vmem>> -> memref<8x8x32xf32, #tpu.memory_space<vmem>>
    %80 = arith.index_cast %56 : i32 to index
    %c0_38 = arith.constant 0 : index
    %c0_39 = arith.constant 0 : index
    %81 = vector.load %79[%80, %c0_38, %c0_39] : memref<8x8x32xf32, #tpu.memory_space<vmem>>, vector<1x8x32xf32>
    %82 = vector.shape_cast %81 : vector<1x8x32xf32> to vector<8x32xf32>
    %83 = vector.shape_cast %77 : vector<8x32xf32> to vector<1x8x32xf32>
    tpu.vector_store %79[%80, %c0_38, %c0_39], %83 {strides = array<i32>} : memref<8x8x32xf32, #tpu.memory_space<vmem>>, vector<1x8x32xf32>,
    %c2_i32 = arith.constant 2 : i32
    %84 = arith.muli %15, %c2_i32 : i32
    %85 = arith.addi %13, %84 : i32
    %86 = arith.index_cast %85 : i32 to index
    %c0_40 = arith.constant 0 : index
    %c0_41 = arith.constant 0 : index
    %87 = vector.load %arg7[%86, %c0_40, %c0_41] : memref<8x8x128xf32, #tpu.memory_space<vmem>>, vector<1x8x128xf32>
    %88 = vector.shape_cast %87 : vector<1x8x128xf32> to vector<8x128xf32>
    %cst_42 = arith.constant dense<0.000000e+00> : vector<8x128xf32>
    %89 = tpu.matmul %77, %17, %cst_42 {dimension_numbers = #tpu.dot_dimension_numbers<[1], [0], [0], [1], [0, 0, 1, 1], [], []>} : vector<8x32xf32>, vector<32x128xf32>, vector<8x128xf32> -> vector<8x128xf32>
    %90 = arith.addf %88, %89 : vector<8x128xf32>
    %91 = math.tanh %90 : vector<8x128xf32>
    %92 = arith.negf %90 : vector<8x128xf32>
    %93 = math.exp %92 : vector<8x128xf32>
    %cst_43 = arith.constant 1.000000e+00 : f32
    %94 = vector.broadcast %cst_43 : f32 to vector<8x128xf32>
    %95 = arith.addf %94, %93 : vector<8x128xf32>
    %96 = arith.divf %94, %95 : vector<8x128xf32>
    %97 = arith.select %23, %91, %96 : vector<8x128xi1>, vector<8x128xf32>
    %98 = vector.extract_strided_slice %97 {offsets = [0, 0], sizes = [8, 32], strides = [1, 1]} : vector<8x128xf32> to vector<8x32xf32>
    %99 = vector.extract_strided_slice %97 {offsets = [0, 32], sizes = [8, 32], strides = [1, 1]} : vector<8x128xf32> to vector<8x32xf32>
    %100 = vector.extract_strided_slice %97 {offsets = [0, 64], sizes = [8, 32], strides = [1, 1]} : vector<8x128xf32> to vector<8x32xf32>
    %101 = vector.extract_strided_slice %97 {offsets = [0, 96], sizes = [8, 32], strides = [1, 1]} : vector<8x128xf32> to vector<8x32xf32>
    %102 = arith.mulf %99, %75 : vector<8x32xf32>
    %103 = arith.mulf %98, %100 : vector<8x32xf32>
    %104 = arith.addf %102, %103 : vector<8x32xf32>
    %105 = math.tanh %104 : vector<8x32xf32>
    %106 = arith.mulf %101, %105 : vector<8x32xf32>
    %c0_i32_44 = arith.constant 0 : i32
    %c0_i32_45 = arith.constant 0 : i32
    %c0_i32_46 = arith.constant 0 : i32
    %107 = tpu.memref_slice %arg5[%c0_i32_19, %c0_i32_44, %c0_i32_45, %c0_i32_46] : memref<1x8x8x32xf32, #tpu.memory_space<vmem>> -> memref<1x8x8x32xf32, #tpu.memory_space<vmem>>
    %108 = tpu.memref_squeeze %107 : memref<1x8x8x32xf32, #tpu.memory_space<vmem>> -> memref<8x8x32xf32, #tpu.memory_space<vmem>>
    %109 = arith.index_cast %85 : i32 to index
    %c0_47 = arith.constant 0 : index
    %c0_48 = arith.constant 0 : index
    %110 = vector.load %108[%109, %c0_47, %c0_48] : memref<8x8x32xf32, #tpu.memory_space<vmem>>, vector<1x8x32xf32>
    %111 = vector.shape_cast %110 : vector<1x8x32xf32> to vector<8x32xf32>
    %112 = vector.shape_cast %106 : vector<8x32xf32> to vector<1x8x32xf32>
    tpu.vector_store %108[%109, %c0_47, %c0_48], %112 {strides = array<i32>} : memref<8x8x32xf32, #tpu.memory_space<vmem>>, vector<1x8x32xf32>,
    %c3_i32 = arith.constant 3 : i32
    %113 = arith.muli %15, %c3_i32 : i32
    %114 = arith.addi %13, %113 : i32
    %115 = arith.index_cast %114 : i32 to index
    %c0_49 = arith.constant 0 : index
    %c0_50 = arith.constant 0 : index
    %116 = vector.load %arg7[%115, %c0_49, %c0_50] : memref<8x8x128xf32, #tpu.memory_space<vmem>>, vector<1x8x128xf32>
    %117 = vector.shape_cast %116 : vector<1x8x128xf32> to vector<8x128xf32>
    %cst_51 = arith.constant dense<0.000000e+00> : vector<8x128xf32>
    %118 = tpu.matmul %106, %17, %cst_51 {dimension_numbers = #tpu.dot_dimension_numbers<[1], [0], [0], [1], [0, 0, 1, 1], [], []>} : vector<8x32xf32>, vector<32x128xf32>, vector<8x128xf32> -> vector<8x128xf32>
    %119 = arith.addf %117, %118 : vector<8x128xf32>
    %120 = math.tanh %119 : vector<8x128xf32>
    %121 = arith.negf %119 : vector<8x128xf32>
    %122 = math.exp %121 : vector<8x128xf32>
    %cst_52 = arith.constant 1.000000e+00 : f32
    %123 = vector.broadcast %cst_52 : f32 to vector<8x128xf32>
    %124 = arith.addf %123, %122 : vector<8x128xf32>
    %125 = arith.divf %123, %124 : vector<8x128xf32>
    %126 = arith.select %23, %120, %125 : vector<8x128xi1>, vector<8x128xf32>
    %127 = vector.extract_strided_slice %126 {offsets = [0, 0], sizes = [8, 32], strides = [1, 1]} : vector<8x128xf32> to vector<8x32xf32>
    %128 = vector.extract_strided_slice %126 {offsets = [0, 32], sizes = [8, 32], strides = [1, 1]} : vector<8x128xf32> to vector<8x32xf32>
    %129 = vector.extract_strided_slice %126 {offsets = [0, 64], sizes = [8, 32], strides = [1, 1]} : vector<8x128xf32> to vector<8x32xf32>
    %130 = vector.extract_strided_slice %126 {offsets = [0, 96], sizes = [8, 32], strides = [1, 1]} : vector<8x128xf32> to vector<8x32xf32>
    %131 = arith.mulf %128, %104 : vector<8x32xf32>
    %132 = arith.mulf %127, %129 : vector<8x32xf32>
    %133 = arith.addf %131, %132 : vector<8x32xf32>
    %134 = math.tanh %133 : vector<8x32xf32>
    %135 = arith.mulf %130, %134 : vector<8x32xf32>
    %c0_i32_53 = arith.constant 0 : i32
    %c0_i32_54 = arith.constant 0 : i32
    %c0_i32_55 = arith.constant 0 : i32
    %136 = tpu.memref_slice %arg5[%c0_i32_19, %c0_i32_53, %c0_i32_54, %c0_i32_55] : memref<1x8x8x32xf32, #tpu.memory_space<vmem>> -> memref<1x8x8x32xf32, #tpu.memory_space<vmem>>
    %137 = tpu.memref_squeeze %136 : memref<1x8x8x32xf32, #tpu.memory_space<vmem>> -> memref<8x8x32xf32, #tpu.memory_space<vmem>>
    %138 = arith.index_cast %114 : i32 to index
    %c0_56 = arith.constant 0 : index
    %c0_57 = arith.constant 0 : index
    %139 = vector.load %137[%138, %c0_56, %c0_57] : memref<8x8x32xf32, #tpu.memory_space<vmem>>, vector<1x8x32xf32>
    %140 = vector.shape_cast %139 : vector<1x8x32xf32> to vector<8x32xf32>
    %141 = vector.shape_cast %135 : vector<8x32xf32> to vector<1x8x32xf32>
    tpu.vector_store %137[%138, %c0_56, %c0_57], %141 {strides = array<i32>} : memref<8x8x32xf32, #tpu.memory_space<vmem>>, vector<1x8x32xf32>,
    %c4_i32 = arith.constant 4 : i32
    %142 = arith.muli %15, %c4_i32 : i32
    %143 = arith.addi %13, %142 : i32
    %144 = arith.index_cast %143 : i32 to index
    %c0_58 = arith.constant 0 : index
    %c0_59 = arith.constant 0 : index
    %145 = vector.load %arg7[%144, %c0_58, %c0_59] : memref<8x8x128xf32, #tpu.memory_space<vmem>>, vector<1x8x128xf32>
    %146 = vector.shape_cast %145 : vector<1x8x128xf32> to vector<8x128xf32>
    %cst_60 = arith.constant dense<0.000000e+00> : vector<8x128xf32>
    %147 = tpu.matmul %135, %17, %cst_60 {dimension_numbers = #tpu.dot_dimension_numbers<[1], [0], [0], [1], [0, 0, 1, 1], [], []>} : vector<8x32xf32>, vector<32x128xf32>, vector<8x128xf32> -> vector<8x128xf32>
    %148 = arith.addf %146, %147 : vector<8x128xf32>
    %149 = math.tanh %148 : vector<8x128xf32>
    %150 = arith.negf %148 : vector<8x128xf32>
    %151 = math.exp %150 : vector<8x128xf32>
    %cst_61 = arith.constant 1.000000e+00 : f32
    %152 = vector.broadcast %cst_61 : f32 to vector<8x128xf32>
    %153 = arith.addf %152, %151 : vector<8x128xf32>
    %154 = arith.divf %152, %153 : vector<8x128xf32>
    %155 = arith.select %23, %149, %154 : vector<8x128xi1>, vector<8x128xf32>
    %156 = vector.extract_strided_slice %155 {offsets = [0, 0], sizes = [8, 32], strides = [1, 1]} : vector<8x128xf32> to vector<8x32xf32>
    %157 = vector.extract_strided_slice %155 {offsets = [0, 32], sizes = [8, 32], strides = [1, 1]} : vector<8x128xf32> to vector<8x32xf32>
    %158 = vector.extract_strided_slice %155 {offsets = [0, 64], sizes = [8, 32], strides = [1, 1]} : vector<8x128xf32> to vector<8x32xf32>
    %159 = vector.extract_strided_slice %155 {offsets = [0, 96], sizes = [8, 32], strides = [1, 1]} : vector<8x128xf32> to vector<8x32xf32>
    %160 = arith.mulf %157, %133 : vector<8x32xf32>
    %161 = arith.mulf %156, %158 : vector<8x32xf32>
    %162 = arith.addf %160, %161 : vector<8x32xf32>
    %163 = math.tanh %162 : vector<8x32xf32>
    %164 = arith.mulf %159, %163 : vector<8x32xf32>
    %c0_i32_62 = arith.constant 0 : i32
    %c0_i32_63 = arith.constant 0 : i32
    %c0_i32_64 = arith.constant 0 : i32
    %165 = tpu.memref_slice %arg5[%c0_i32_19, %c0_i32_62, %c0_i32_63, %c0_i32_64] : memref<1x8x8x32xf32, #tpu.memory_space<vmem>> -> memref<1x8x8x32xf32, #tpu.memory_space<vmem>>
    %166 = tpu.memref_squeeze %165 : memref<1x8x8x32xf32, #tpu.memory_space<vmem>> -> memref<8x8x32xf32, #tpu.memory_space<vmem>>
    %167 = arith.index_cast %143 : i32 to index
    %c0_65 = arith.constant 0 : index
    %c0_66 = arith.constant 0 : index
    %168 = vector.load %166[%167, %c0_65, %c0_66] : memref<8x8x32xf32, #tpu.memory_space<vmem>>, vector<1x8x32xf32>
    %169 = vector.shape_cast %168 : vector<1x8x32xf32> to vector<8x32xf32>
    %170 = vector.shape_cast %164 : vector<8x32xf32> to vector<1x8x32xf32>
    tpu.vector_store %166[%167, %c0_65, %c0_66], %170 {strides = array<i32>} : memref<8x8x32xf32, #tpu.memory_space<vmem>>, vector<1x8x32xf32>,
    %c5_i32 = arith.constant 5 : i32
    %171 = arith.muli %15, %c5_i32 : i32
    %172 = arith.addi %13, %171 : i32
    %173 = arith.index_cast %172 : i32 to index
    %c0_67 = arith.constant 0 : index
    %c0_68 = arith.constant 0 : index
    %174 = vector.load %arg7[%173, %c0_67, %c0_68] : memref<8x8x128xf32, #tpu.memory_space<vmem>>, vector<1x8x128xf32>
    %175 = vector.shape_cast %174 : vector<1x8x128xf32> to vector<8x128xf32>
    %cst_69 = arith.constant dense<0.000000e+00> : vector<8x128xf32>
    %176 = tpu.matmul %164, %17, %cst_69 {dimension_numbers = #tpu.dot_dimension_numbers<[1], [0], [0], [1], [0, 0, 1, 1], [], []>} : vector<8x32xf32>, vector<32x128xf32>, vector<8x128xf32> -> vector<8x128xf32>
    %177 = arith.addf %175, %176 : vector<8x128xf32>
    %178 = math.tanh %177 : vector<8x128xf32>
    %179 = arith.negf %177 : vector<8x128xf32>
    %180 = math.exp %179 : vector<8x128xf32>
    %cst_70 = arith.constant 1.000000e+00 : f32
    %181 = vector.broadcast %cst_70 : f32 to vector<8x128xf32>
    %182 = arith.addf %181, %180 : vector<8x128xf32>
    %183 = arith.divf %181, %182 : vector<8x128xf32>
    %184 = arith.select %23, %178, %183 : vector<8x128xi1>, vector<8x128xf32>
    %185 = vector.extract_strided_slice %184 {offsets = [0, 0], sizes = [8, 32], strides = [1, 1]} : vector<8x128xf32> to vector<8x32xf32>
    %186 = vector.extract_strided_slice %184 {offsets = [0, 32], sizes = [8, 32], strides = [1, 1]} : vector<8x128xf32> to vector<8x32xf32>
    %187 = vector.extract_strided_slice %184 {offsets = [0, 64], sizes = [8, 32], strides = [1, 1]} : vector<8x128xf32> to vector<8x32xf32>
    %188 = vector.extract_strided_slice %184 {offsets = [0, 96], sizes = [8, 32], strides = [1, 1]} : vector<8x128xf32> to vector<8x32xf32>
    %189 = arith.mulf %186, %162 : vector<8x32xf32>
    %190 = arith.mulf %185, %187 : vector<8x32xf32>
    %191 = arith.addf %189, %190 : vector<8x32xf32>
    %192 = math.tanh %191 : vector<8x32xf32>
    %193 = arith.mulf %188, %192 : vector<8x32xf32>
    %c0_i32_71 = arith.constant 0 : i32
    %c0_i32_72 = arith.constant 0 : i32
    %c0_i32_73 = arith.constant 0 : i32
    %194 = tpu.memref_slice %arg5[%c0_i32_19, %c0_i32_71, %c0_i32_72, %c0_i32_73] : memref<1x8x8x32xf32, #tpu.memory_space<vmem>> -> memref<1x8x8x32xf32, #tpu.memory_space<vmem>>
    %195 = tpu.memref_squeeze %194 : memref<1x8x8x32xf32, #tpu.memory_space<vmem>> -> memref<8x8x32xf32, #tpu.memory_space<vmem>>
    %196 = arith.index_cast %172 : i32 to index
    %c0_74 = arith.constant 0 : index
    %c0_75 = arith.constant 0 : index
    %197 = vector.load %195[%196, %c0_74, %c0_75] : memref<8x8x32xf32, #tpu.memory_space<vmem>>, vector<1x8x32xf32>
    %198 = vector.shape_cast %197 : vector<1x8x32xf32> to vector<8x32xf32>
    %199 = vector.shape_cast %193 : vector<8x32xf32> to vector<1x8x32xf32>
    tpu.vector_store %195[%196, %c0_74, %c0_75], %199 {strides = array<i32>} : memref<8x8x32xf32, #tpu.memory_space<vmem>>, vector<1x8x32xf32>,
    %c6_i32 = arith.constant 6 : i32
    %200 = arith.muli %15, %c6_i32 : i32
    %201 = arith.addi %13, %200 : i32
    %202 = arith.index_cast %201 : i32 to index
    %c0_76 = arith.constant 0 : index
    %c0_77 = arith.constant 0 : index
    %203 = vector.load %arg7[%202, %c0_76, %c0_77] : memref<8x8x128xf32, #tpu.memory_space<vmem>>, vector<1x8x128xf32>
    %204 = vector.shape_cast %203 : vector<1x8x128xf32> to vector<8x128xf32>
    %cst_78 = arith.constant dense<0.000000e+00> : vector<8x128xf32>
    %205 = tpu.matmul %193, %17, %cst_78 {dimension_numbers = #tpu.dot_dimension_numbers<[1], [0], [0], [1], [0, 0, 1, 1], [], []>} : vector<8x32xf32>, vector<32x128xf32>, vector<8x128xf32> -> vector<8x128xf32>
    %206 = arith.addf %204, %205 : vector<8x128xf32>
    %207 = math.tanh %206 : vector<8x128xf32>
    %208 = arith.negf %206 : vector<8x128xf32>
    %209 = math.exp %208 : vector<8x128xf32>
    %cst_79 = arith.constant 1.000000e+00 : f32
    %210 = vector.broadcast %cst_79 : f32 to vector<8x128xf32>
    %211 = arith.addf %210, %209 : vector<8x128xf32>
    %212 = arith.divf %210, %211 : vector<8x128xf32>
    %213 = arith.select %23, %207, %212 : vector<8x128xi1>, vector<8x128xf32>
    %214 = vector.extract_strided_slice %213 {offsets = [0, 0], sizes = [8, 32], strides = [1, 1]} : vector<8x128xf32> to vector<8x32xf32>
    %215 = vector.extract_strided_slice %213 {offsets = [0, 32], sizes = [8, 32], strides = [1, 1]} : vector<8x128xf32> to vector<8x32xf32>
    %216 = vector.extract_strided_slice %213 {offsets = [0, 64], sizes = [8, 32], strides = [1, 1]} : vector<8x128xf32> to vector<8x32xf32>
    %217 = vector.extract_strided_slice %213 {offsets = [0, 96], sizes = [8, 32], strides = [1, 1]} : vector<8x128xf32> to vector<8x32xf32>
    %218 = arith.mulf %215, %191 : vector<8x32xf32>
    %219 = arith.mulf %214, %216 : vector<8x32xf32>
    %220 = arith.addf %218, %219 : vector<8x32xf32>
    %221 = math.tanh %220 : vector<8x32xf32>
    %222 = arith.mulf %217, %221 : vector<8x32xf32>
    %c0_i32_80 = arith.constant 0 : i32
    %c0_i32_81 = arith.constant 0 : i32
    %c0_i32_82 = arith.constant 0 : i32
    %223 = tpu.memref_slice %arg5[%c0_i32_19, %c0_i32_80, %c0_i32_81, %c0_i32_82] : memref<1x8x8x32xf32, #tpu.memory_space<vmem>> -> memref<1x8x8x32xf32, #tpu.memory_space<vmem>>
    %224 = tpu.memref_squeeze %223 : memref<1x8x8x32xf32, #tpu.memory_space<vmem>> -> memref<8x8x32xf32, #tpu.memory_space<vmem>>
    %225 = arith.index_cast %201 : i32 to index
    %c0_83 = arith.constant 0 : index
    %c0_84 = arith.constant 0 : index
    %226 = vector.load %224[%225, %c0_83, %c0_84] : memref<8x8x32xf32, #tpu.memory_space<vmem>>, vector<1x8x32xf32>
    %227 = vector.shape_cast %226 : vector<1x8x32xf32> to vector<8x32xf32>
    %228 = vector.shape_cast %222 : vector<8x32xf32> to vector<1x8x32xf32>
    tpu.vector_store %224[%225, %c0_83, %c0_84], %228 {strides = array<i32>} : memref<8x8x32xf32, #tpu.memory_space<vmem>>, vector<1x8x32xf32>,
    %c7_i32_85 = arith.constant 7 : i32
    %229 = arith.muli %15, %c7_i32_85 : i32
    %230 = arith.addi %13, %229 : i32
    %231 = arith.index_cast %230 : i32 to index
    %c0_86 = arith.constant 0 : index
    %c0_87 = arith.constant 0 : index
    %232 = vector.load %arg7[%231, %c0_86, %c0_87] : memref<8x8x128xf32, #tpu.memory_space<vmem>>, vector<1x8x128xf32>
    %233 = vector.shape_cast %232 : vector<1x8x128xf32> to vector<8x128xf32>
    %cst_88 = arith.constant dense<0.000000e+00> : vector<8x128xf32>
    %234 = tpu.matmul %222, %17, %cst_88 {dimension_numbers = #tpu.dot_dimension_numbers<[1], [0], [0], [1], [0, 0, 1, 1], [], []>} : vector<8x32xf32>, vector<32x128xf32>, vector<8x128xf32> -> vector<8x128xf32>
    %235 = arith.addf %233, %234 : vector<8x128xf32>
    %236 = math.tanh %235 : vector<8x128xf32>
    %237 = arith.negf %235 : vector<8x128xf32>
    %238 = math.exp %237 : vector<8x128xf32>
    %cst_89 = arith.constant 1.000000e+00 : f32
    %239 = vector.broadcast %cst_89 : f32 to vector<8x128xf32>
    %240 = arith.addf %239, %238 : vector<8x128xf32>
    %241 = arith.divf %239, %240 : vector<8x128xf32>
    %242 = arith.select %23, %236, %241 : vector<8x128xi1>, vector<8x128xf32>
    %243 = vector.extract_strided_slice %242 {offsets = [0, 0], sizes = [8, 32], strides = [1, 1]} : vector<8x128xf32> to vector<8x32xf32>
    %244 = vector.extract_strided_slice %242 {offsets = [0, 32], sizes = [8, 32], strides = [1, 1]} : vector<8x128xf32> to vector<8x32xf32>
    %245 = vector.extract_strided_slice %242 {offsets = [0, 64], sizes = [8, 32], strides = [1, 1]} : vector<8x128xf32> to vector<8x32xf32>
    %246 = vector.extract_strided_slice %242 {offsets = [0, 96], sizes = [8, 32], strides = [1, 1]} : vector<8x128xf32> to vector<8x32xf32>
    %247 = arith.mulf %244, %220 : vector<8x32xf32>
    %248 = arith.mulf %243, %245 : vector<8x32xf32>
    %249 = arith.addf %247, %248 : vector<8x32xf32>
    %250 = math.tanh %249 : vector<8x32xf32>
    %251 = arith.mulf %246, %250 : vector<8x32xf32>
    %c0_i32_90 = arith.constant 0 : i32
    %c0_i32_91 = arith.constant 0 : i32
    %c0_i32_92 = arith.constant 0 : i32
    %252 = tpu.memref_slice %arg5[%c0_i32_19, %c0_i32_90, %c0_i32_91, %c0_i32_92] : memref<1x8x8x32xf32, #tpu.memory_space<vmem>> -> memref<1x8x8x32xf32, #tpu.memory_space<vmem>>
    %253 = tpu.memref_squeeze %252 : memref<1x8x8x32xf32, #tpu.memory_space<vmem>> -> memref<8x8x32xf32, #tpu.memory_space<vmem>>
    %254 = arith.index_cast %230 : i32 to index
    %c0_93 = arith.constant 0 : index
    %c0_94 = arith.constant 0 : index
    %255 = vector.load %253[%254, %c0_93, %c0_94] : memref<8x8x32xf32, #tpu.memory_space<vmem>>, vector<1x8x32xf32>
    %256 = vector.shape_cast %255 : vector<1x8x32xf32> to vector<8x32xf32>
    %257 = vector.shape_cast %251 : vector<8x32xf32> to vector<1x8x32xf32>
    tpu.vector_store %253[%254, %c0_93, %c0_94], %257 {strides = array<i32>} : memref<8x8x32xf32, #tpu.memory_space<vmem>>, vector<1x8x32xf32>,
    %c8_i32 = arith.constant 8 : i32
    %c0_95 = arith.constant 0 : index
    %c0_96 = arith.constant 0 : index
    %c0_97 = arith.constant 0 : index
    %258 = vector.load %arg6[%c0_95, %c0_96, %c0_97] : memref<1x8x32xf32, #tpu.memory_space<vmem>>, vector<1x8x32xf32>
    %259 = vector.shape_cast %258 : vector<1x8x32xf32> to vector<8x32xf32>
    %260 = vector.shape_cast %251 : vector<8x32xf32> to vector<1x8x32xf32>
    tpu.vector_store %arg6[%c0_95, %c0_96, %c0_97], %260 {strides = array<i32>} : memref<1x8x32xf32, #tpu.memory_space<vmem>>, vector<1x8x32xf32>,
    return
  }
  func.func @transform_0(%arg0: i32) -> (i32, i32, i32, i32) {
    %c0_i32 = arith.constant 0 : i32
    %c0_i32_0 = arith.constant 0 : i32
    %c0_i32_1 = arith.constant 0 : i32
    %c0_i32_2 = arith.constant 0 : i32
    %c0_i32_3 = arith.constant 0 : i32
    return %c0_i32, %c0_i32_0, %c0_i32_1, %c0_i32_2 : i32, i32, i32, i32
  }
  func.func @transform_1(%arg0: i32) -> (i32, i32, i32) {
    %c0_i32 = arith.constant 0 : i32
    %c0_i32_0 = arith.constant 0 : i32
    %c0_i32_1 = arith.constant 0 : i32
    return %arg0, %c0_i32, %c0_i32_0 : i32, i32, i32
  }
  func.func @transform_2(%arg0: i32) -> (i32, i32, i32) {
    %c0_i32 = arith.constant 0 : i32
    %c0_i32_0 = arith.constant 0 : i32
    %c0_i32_1 = arith.constant 0 : i32
    return %arg0, %c0_i32, %c0_i32_0 : i32, i32, i32
  }
  func.func @transform_3(%arg0: i32) -> (i32, i32, i32) {
    %c0_i32 = arith.constant 0 : i32
    %c0_i32_0 = arith.constant 0 : i32
    %c0_i32_1 = arith.constant 0 : i32
    return %arg0, %c0_i32, %c0_i32_0 : i32, i32, i32
  }
  func.func @transform_4(%arg0: i32) -> (i32, i32, i32, i32) {
    %c0_i32 = arith.constant 0 : i32
    %c0_i32_0 = arith.constant 0 : i32
    %c0_i32_1 = arith.constant 0 : i32
    %c0_i32_2 = arith.constant 0 : i32
    return %arg0, %c0_i32, %c0_i32_0, %c0_i32_1 : i32, i32, i32, i32
  }
  func.func @transform_5(%arg0: i32) -> (i32, i32, i32) {
    %c0_i32 = arith.constant 0 : i32
    %c0_i32_0 = arith.constant 0 : i32
    %c0_i32_1 = arith.constant 0 : i32
    return %arg0, %c0_i32, %c0_i32_0 : i32, i32, i32
  }
}

</mosaic_0001>

<bundles_post_ra>
// kernel: multi_lstm_forward.2
= control target key start
LH: loop header
LB: loop body
LE: loop exit
PB: predicated region body
PF: predicated region fallthrough
CT: control target
= control target key end

     0   :  { %s2278_s0 = inlined_call_operand.vmem [shape: f32[1,8,8,16], index: 0, kind: input, shape index: {}]   ;;  %s2279_s1 = inlined_call_operand.vmem [shape: f32[2,16,128], index: 1, kind: input, shape index: {}]   ;;  %s2280_s2 = inlined_call_operand.vmem [shape: f32[2,32,128], index: 2, kind: input, shape index: {}]   ;;  %s2281_s3 = inlined_call_operand.vmem [shape: f32[2,1,128], index: 3, kind: input, shape index: {}]   ;;  %s2282_s4 = inlined_call_operand.vmem [shape: f32[2,8,8,32], index: 4, kind: output, shape index: {0}]   ;;  %s2283_s5 = inlined_call_operand.hbm [shape: f32[2,8,32], index: 5, kind: output, shape index: {1}]  }
   0x1   :  { %2284 = sst [smem:[#allocation6_spill]] %s2278_s0 }
   0x2   :  { %2285 = sst [smem:[#allocation7_spill]] %s2279_s1 }
   0x3   :  { %11 = vsyncpa [#allocation4], 0 }
   0x4   :  { %13 = vsyncpa [#allocation4 + $0x1], 0  ;;  %s1912_s18 = smov 0   ;;  %s1914_s19 = smov 0  }
   0x5   :  { %s1916_s20 = smov 0   ;;  %s1918_s21 = smov 0  }
   0x6 LB: > { %s1933_s22 = sadd.s32 4294967295, %s1875_s21   ;;  %s1502_s23 = sadd.s32 4294967294, %s1875_s21   ;;  %s1875_s21 = sphi %s1918_s21, %s2295_s21   ;;  %s1871_s20 = sphi %s1916_s20, %s2294_s20   ;;  %s1867_s19 = sphi %s1914_s19, %s2293_s19   ;;  %s1863_s18 = sphi %s1912_s18, %s2292_s18  }
   0x7   : > { %s1937_s24 = sadd.s32 1, %s1875_s21   ;;  %s151_s25 = sadd.s32 1, %s1871_s20 }
   0x8   : > { %s148_s26 = ssub.s32 %s1875_s21, %s1937_s24  ;;  %p161_p0 = scmp.ne.s32.totalorder %s1871_s20, %s1867_s19 }
   0x9   : > { %p149_p1 = scmp.eq.s32.totalorder %s148_s26, 0  ;;  %p162_p2 = scmp.eq.s32.totalorder %s1933_s22, 1 }
   0xa   : > { %p167_p3 = scmp.ne.s32.totalorder %s1867_s19, %s1863_s18  ;;  %p168_p4 = scmp.eq.s32.totalorder %s1502_s23, 1 }
   0xb   : > { %s1948_s27 = scalar_select %p149_p1, %s1871_s20, %s151_s25  }
   0xc   : > { %p1950_p5 = por %p162_p2, %p161_p0  ;;  %p1954_p6 = por %p168_p4, %p167_p3 }
   0xd   : > { %p1505_p7 = scmp.ge.s32.totalorder %s1875_s21, 1  ;;  %p211_p8 = scmp.lt.s32.totalorder %s1875_s21, 3 }
   0xf   : > { %p212_p9 = pnand %p1505_p7, %p211_p8 }
  0x10   : > { %p252_p10 = scmp.lt.s32.totalorder (!%p212_p9), %s1933_s22, 1  ;;  %s2288_s0 = sld [smem:[#allocation6_spill]] (!%p212_p9) }
  0x11   : > { %215 = sbr.rel (%p212_p9) target bundleno = 5732 (0x1664), region = 36  ;;  %s2289_s1 = sld [smem:[#allocation7_spill]] (!%p212_p9) }
  0x12   : > { %p433_p11 = scmp.eq.s32.totalorder (!%p212_p9), %s1933_s22, 0 }
  0x16   : > { %v270_v0 = vld [vmem:[%s2288_s0] sm:$0xff]  ;;  %vm281_vm0 = vcmask 130048   ;;  %v1877_v1 = vmov 0.0   ;;  %s1967_s7 = scalar_select %p252_p10, %s1933_s22, 1  ;;  %vm1878_vm1 = vmmov 0   ;;  %v271_v6 = vld [vmem:[%s2288_s0 + $0x8] sm:$0xff]  ;;  %v440_v39 = vlaneseq }
  0x17   : > { %1608 = vmatprep.mubr.msk.f32.mxu0 %vm281_vm0, %v270_v0  ;;  %1620 = vmatprep.subr.mxu1 %v1877_v1  ;;  %v272_v8 = vld [vmem:[%s2288_s0 + $0x10] sm:$0xff]  ;;  %v273_v10 = vld [vmem:[%s2288_s0 + $0x18] sm:$0xff]  ;;  %v274_v11 = vld [vmem:[%s2288_s0 + $0x20] sm:$0xff]  ;;  %s2048_s16 = scalar_select %p433_p11, 0, 7  ;;  %vm448_vm5 = vcmask 261120  }
  0x18   : > { %1628 = vmatprep.mubr.msk.f32.mxu1 %vm1878_vm1, %v1877_v1  ;;  %s1551_s8 = sshll.u32 %s1967_s7, 4  ;;  %s1552_s9 = sshll.u32 %s1967_s7, 5  ;;  %v275_v12 = vld [vmem:[%s2288_s0 + $0x28] sm:$0xff]  ;;  %v276_v13 = vld [vmem:[%s2288_s0 + $0x30] sm:$0xff]  ;;  %v277_v14 = vld [vmem:[%s2288_s0 + $0x38] sm:$0xff]  ;;  %v441_v40 = vand.u32 127, %v440_v39 }
  0x19   : > { %s256_s12 = scalar_lea.vmem %s2289_s1, %s1551_s8  ;;  %s261_s15 = scalar_lea.vmem %s2280_s2, %s1552_s9 }
  0x1a   : > { %v280_v2 = vld [vmem:[%s256_s12 + $0x8] sm:$0xff]  ;;  %v279_v3 = vld [vmem:[%s256_s12] sm:$0xff]  ;;  %v1979_v4 = vld [vmem:[%s261_s15 + $0x18] sm:$0xff]  ;;  %s1522_s0 = sshll.u32 %s2048_s16, 3  ;;  %vm442_vm2 = vcmp.ge.s32.totalorder %v441_v40, 64  ;;  %vm443_vm3 = vcmp.lt.s32.totalorder %v441_v40, 96 }
  0x1b   : > { %1604 = vmatprep.subr.mxu0 %v280_v2  ;;  %1621 = vmatpush3.msra.mxu1 %v1979_v4  ;;  %v1982_v5 = vld [vmem:[%s261_s15 + $0x10] sm:$0xff]  ;;  %v1988_v7 = vld [vmem:[%s261_s15 + $0x8] sm:$0xff]  ;;  %v1995_v9 = vld [vmem:[%s261_s15] sm:$0xff]  ;;  %s2046_s15 = scalar_select %p433_p11, 1, 4294967295 }
  0x1c   : > { %1605 = vmatpush3.msra.mxu0 %v280_v2  ;;  %1622 = vmatprep.subr.mxu1 %v1877_v1  ;;  %s446_s1 = scalar_lea.vmem [#allocation2], %s1522_s0  ;;  %vm2083_vm4 = vmand %vm442_vm2, %vm443_vm3 }
  0x1d   : > { %1606 = vmatprep.subr.mxu0 %v279_v3  ;;  %1623 = vmatpush3.msra.mxu1 %v1982_v5  ;;  %s1527_s17 = sshll.u32 %s2046_s15, 1  ;;  %s771_s25 = smul.u32 3, %s2046_s15 }
  0x1e   : > { %1607 = vmatpush3.msra.mxu0 %v279_v3  ;;  %1624 = vmatprep.subr.mxu1 %v1877_v1  ;;  %s2052_s23 = sadd.s32 %s1527_s17, %s2048_s16  ;;  %s1534_s26 = sshll.u32 %s2046_s15, 2 }
  0x1f   : > { %1609 = vmatmul.mubr.msk.f32.vlgmr.msra.gmra.mxu0 %vm281_vm0, %v271_v6  ;;  %1625 = vmatpush3.msra.mxu1 %v1988_v7  ;;  %s2057_s30 = sadd.s32 %s771_s25, %s2048_s16  ;;  %s989_s6 = smul.u32 5, %s2046_s15 }
  0x20   : > { %1611 = vmatprep.mubr.msk.f32.mxu0 %vm281_vm0, %v272_v8  ;;  %1626 = vmatprep.subr.mxu1 %v1877_v1  ;;  %s2061_s8 = sadd.s32 %s1534_s26, %s2048_s16  ;;  %s554_s9 = sadd.s32 %s2046_s15, %s2048_s16 }
  0x21   : > { %1627 = vmatpush3.msra.mxu1 %v1995_v9  ;;  %1642 = vmatprep.subr.mxu0 %v1877_v1  ;;  %s2066_s10 = sadd.s32 %s989_s6, %s2048_s16  ;;  %s1098_s11 = smul.u32 6, %s2046_s15 }
  0x22   : > { %1629 = vmatmul.mubr.f32.vlgmr.msra.gmra.mxu1 %v1877_v1  ;;  %1631 = vmatprep.subr.mxu1 %v1877_v1  ;;  %s1207_s12 = smul.u32 7, %s2046_s15  ;;  %s264_s17 = scalar_lea.vmem %s2281_s3, %s1967_s7 }
  0x23   : > { %1612 = vmatmul.mubr.msk.f32.gmra.mxu0 %vm281_vm0, %v273_v10  ;;  %1632 = vmatpush3.msra.mxu1 %v1979_v4  ;;  %s2071_s13 = sadd.s32 %s1098_s11, %s2048_s16  ;;  %v1521_v15 = vld [vmem:[%s264_s17] ss:$0 sm:$0xff]  ;;  %s1879_s25 = smov 64  }
  0x24   : > { %1614 = vmatprep.mubr.msk.f32.mxu0 %vm281_vm0, %v274_v11  ;;  %1633 = vmatprep.subr.mxu1 %v1877_v1  ;;  %s2074_s14 = sadd.s32 %s1207_s12, %s2048_s16  ;;  %s1880_s26 = smov 32  }
  0x25   : > { %1634 = vmatpush3.msra.mxu1 %v1982_v5  ;;  %1639 = vmatprep.mubr.msk.f32.mxu1 %vm1878_vm1, %v1877_v1  ;;  %s1553_s6 = sshll.u32 %s1967_s7, 6  ;;  %s2117_s7 = sshll.u32 %s554_s9, 3 }
  0x26   : > { %1635 = vmatprep.subr.mxu1 %v1877_v1  ;;  %1643 = vmatpush3.msra.mxu0 %v1979_v4  ;;  %s2097_s17 = scalar_lea.vmem %s2282_s4, %s1553_s6  ;;  %s1528_s16 = sshll.u32 %s2052_s23, 3 }
  0x27   : > { %1615 = vmatmul.mubr.msk.f32.gmra.mxu0 %vm281_vm0, %v275_v12  ;;  %1636 = vmatpush3.msra.mxu1 %v1988_v7  ;;  %s660_s15 = scalar_lea.vmem %s2097_s17, %s2117_s7  ;;  %s665_s9 = scalar_lea.vmem [#allocation2], %s1528_s16 }
  0x28   : > { %1617 = vmatprep.mubr.msk.f32.mxu0 %vm281_vm0, %v276_v13  ;;  %1637 = vmatprep.subr.mxu1 %v1877_v1  ;;  %s769_s23 = scalar_lea.vmem %s2097_s17, %s1528_s16  ;;  %s1531_s6 = sshll.u32 %s2057_s30, 3 }
  0x29   : > { %1638 = vmatpush3.msra.mxu1 %v1995_v9  ;;  %1644 = vmatprep.subr.mxu0 %v1877_v1  ;;  %s774_s11 = scalar_lea.vmem [#allocation2], %s1531_s6  ;;  %s878_s30 = scalar_lea.vmem %s2097_s17, %s1531_s6 }
  0x2a   : > { %1645 = vmatpush3.msra.mxu0 %v1982_v5  ;;  %1653 = vmatprep.subr.mxu1 %v1877_v1  ;;  %s1535_s12 = sshll.u32 %s2061_s8, 3  ;;  %s249_s6 = sand.u32 1, %s1867_s19  }
  0x2b   : > { %1618 = vmatmul.mubr.msk.f32.gmra.mxu0 %vm281_vm0, %v277_v14  ;;  %1646 = vmatprep.subr.mxu0 %v1877_v1  ;;  %s987_s8 = scalar_lea.vmem %s2097_s17, %s1535_s12 }
  0x2c   : > { %1647 = vmatpush3.msra.mxu0 %v1988_v7  ;;  %1650 = vmatprep.mubr.msk.f32.mxu0 %vm1878_vm1, %v1877_v1 }
  0x2d   : > { %1648 = vmatprep.subr.mxu0 %v1877_v1 }
  0x2e   : > { %1649 = vmatpush3.msra.mxu0 %v1995_v9 }
  0x2f   : > { %1664 = vmatprep.subr.mxu0 %v1877_v1 }
  0xdf   : > { %v1610_v16 = vpop.f32.mrf.mxu0 }
  0xe0   : > { %v418_v17 = vadd.f32 %v1610_v16, %v1521_v15 }
  0xe1   : > { %v372_v18 = vpop.f32.mrf.mxu0 }
  0xe2   : > { %426 = vst [vmem:[#allocation2 + $0x8] sm:$0xff] %v418_v17  ;;  %v417_v19 = vadd.f32 %v1521_v15, %v372_v18  ;;  %v518_v20 = vpop.f32.mrf.mxu1 }
  0xe3   : > { %v1613_v21 = vpop.f32.mrf.mxu0 }
  0xe4   : > { %425 = vst [vmem:[#allocation2] sm:$0xff] %v417_v19  ;;  %v420_v22 = vadd.f32 %v1613_v21, %v1521_v15  ;;  %v1630_v23 = vpop.f32.mrf.mxu1 }
  0xe5   : > { %v382_v24 = vpop.f32.mrf.mxu0 }
  0xe6   : > { %428 = vst [vmem:[#allocation2 + $0x18] sm:$0xff] %v420_v22  ;;  %v419_v25 = vadd.f32 %v1521_v15, %v382_v24 }
  0xe7   : > { %v1616_v26 = vpop.f32.mrf.mxu0 }
  0xe8   : > { %427 = vst [vmem:[#allocation2 + $0x10] sm:$0xff] %v419_v25  ;;  %v422_v27 = vadd.f32 %v1616_v26, %v1521_v15 }
  0xe9   : > { %v392_v28 = vpop.f32.mrf.mxu0 }
  0xea   : > { %430 = vst [vmem:[#allocation2 + $0x28] sm:$0xff] %v422_v27  ;;  %v421_v29 = vadd.f32 %v1521_v15, %v392_v28 }
  0xeb   : > { %v1619_v30 = vpop.f32.mrf.mxu0 }
  0xec   : > { %429 = vst [vmem:[#allocation2 + $0x20] sm:$0xff] %v421_v29  ;;  %v424_v31 = vadd.f32 %v1619_v30, %v1521_v15 }
  0xed   : > { %v402_v32 = vpop.f32.mrf.mxu0 }
  0xee   : > { %432 = vst [vmem:[#allocation2 + $0x38] sm:$0xff] %v424_v31  ;;  %v423_v33 = vadd.f32 %v1521_v15, %v402_v32 }
  0xf0   : > { %431 = vst [vmem:[#allocation2 + $0x30] sm:$0xff] %v423_v33 }
  0xf7   : > { %v447_v34 = vld [vmem:[%s446_s1] sm:$0xff]  ;;  %s552_s1 = scalar_lea.vmem %s2097_s17, %s1522_s0  ;;  %s556_s0 = scalar_lea.vmem [#allocation2], %s2117_s7 }
  0xf8   : > { %v522_v35 = vadd.f32 %v518_v20, %v447_v34  ;;  %v557_v54 = vld [vmem:[%s556_s0] sm:$0xff]  ;;  %s1538_s7 = sshll.u32 %s2066_s10, 3 }
  0xf9   : > { %v666_v14 = vld [vmem:[%s665_s9] sm:$0xff]  ;;  %s992_s0 = scalar_lea.vmem [#allocation2], %s1538_s7  ;;  %s1096_s10 = scalar_lea.vmem %s2097_s17, %s1538_s7 }
  0xfa   : > { %v1523_v36 = vmul.f32 -1.442695, %v522_v35  ;;  %v775_v33 = vld [vmem:[%s774_s11] sm:$0xff]  ;;  %s1544_s9 = sshll.u32 %s2074_s14, 3  ;;  %s1506_s11 = sshll.u32 %s249_s6, 3 }
  0xfb   : > { %s1881_s14 = smov [#allocation3]  }
  0xfc   : > { %1751 = vpow2.f32 %v1523_v36 }
  0xfd   : > { %1753 = vtanh.f32 %v522_v35 }
 0x109   : > { %v1752_v37 = vpop.eup %1751 }
 0x10a   : > { %v527_v38 = vadd.f32 1.0, %v1752_v37  ;;  %v1754_v42 = vpop.eup %1753 }
 0x10c   : > { %1755 = vrcp.f32 %v527_v38 }
 0x119   : > { %v1756_v43 = vpop.eup %1755 }
 0x11a   : > { %v530_v44 = vsel %vm2083_vm4, %v1754_v42, %v1756_v43 }
 0x11b   : > { %533 = vrot.lane.b32.xlu0 %v530_v44, %s1879_s25  ;;  %v531_v47 = vmul.f32 0.0, %v530_v44 }
 0x18d   : > { %v534_v45 = vpop.permute.xlu0 %533 }
 0x18e   : > { %v536_v46 = vmul.f32 %v534_v45, %v530_v44 }
 0x190   : > { %538 = vrot.lane.b32.xlu0 %v536_v46, %s1880_s26 }
 0x202   : > { %v539_v48 = vpop.permute.xlu0 %538 }
 0x203   : > { %v541_v49 = vadd.f32 %v539_v48, %v531_v47 }
 0x205   : > { %1757 = vtanh.f32 %v541_v49 }
 0x212   : > { %v1758_v50 = vpop.eup %1757 }
 0x213   : > { %544 = vrot.lane.b32.xlu1 %v1758_v50, %s1879_s25 }
 0x285   : > { %v545_v51 = vpop.permute.xlu1 %544 }
 0x286   : > { %v547_v52 = vmul.f32 %v545_v51, %v530_v44 }
 0x288   : > { %549 = vrot.lane.b32.xlu1 %v547_v52, %s1880_s26 }
 0x2fa   : > { %v550_v53 = vpop.permute.xlu1 %549 }
 0x2fb   : > { %553 = vst.msk [vmem:[%s552_s1] sm:$0xff] %vm448_vm5, %v550_v53  ;;  %1640 = vmatmul.mubr.msk.f32.vlgmr.msra.gmra.mxu1 %vm448_vm5, %v550_v53  ;;  %s883_s1 = scalar_lea.vmem [#allocation2], %s1535_s12  ;;  %s251_s12 = scalar_lea.vmem [#allocation3], %s1506_s11 }
 0x2fc   : > { %1654 = vmatpush3.msra.mxu1 %v1979_v4  ;;  %1661 = vmatprep.mubr.msk.f32.mxu1 %vm1878_vm1, %v1877_v1  ;;  %v884_v53 = vld [vmem:[%s883_s1] sm:$0xff]  ;;  %s1339_s1 = sshll.u32 %s251_s12, 4  ;;  %s2237_s1 = int_to_ptr.vmem [resolvable:$true] %s1339_s1 }
 0x2fd   : > { %1655 = vmatprep.subr.mxu1 %v1877_v1 }
 0x2fe   : > { %1656 = vmatpush3.msra.mxu1 %v1982_v5 }
 0x2ff   : > { %1657 = vmatprep.subr.mxu1 %v1877_v1 }
 0x300   : > { %1658 = vmatpush3.msra.mxu1 %v1988_v7 }
 0x301   : > { %1659 = vmatprep.subr.mxu1 %v1877_v1 }
 0x302   : > { %1660 = vmatpush3.msra.mxu1 %v1995_v9 }
 0x303   : > { %1675 = vmatprep.subr.mxu1 %v1877_v1 }
 0x3bb   : > { %v626_v55 = vpop.f32.mrf.mxu1 }
 0x3bc   : > { %v630_v56 = vadd.f32 %v626_v55, %v557_v54 }
 0x3bd   : > { %v1641_v57 = vpop.f32.mrf.mxu1 }
 0x3be   : > { %v1526_v58 = vmul.f32 -1.442695, %v630_v56 }
 0x3c0   : > { %1759 = vpow2.f32 %v1526_v58 }
 0x3c1   : > { %1761 = vtanh.f32 %v630_v56 }
 0x3cd   : > { %v1760_v59 = vpop.eup %1759 }
 0x3ce   : > { %v635_v60 = vadd.f32 1.0, %v1760_v59  ;;  %v1762_v61 = vpop.eup %1761 }
 0x3d0   : > { %1763 = vrcp.f32 %v635_v60 }
 0x3dd   : > { %v1764_v62 = vpop.eup %1763 }
 0x3de   : > { %v638_v63 = vsel %vm2083_vm4, %v1762_v61, %v1764_v62 }
 0x3df   : > { %641 = vrot.lane.b32.xlu0 %v638_v63, %s1879_s25  ;;  %v639_v3 = vmul.f32 %v638_v63, %v541_v49 }
 0x451   : > { %v642_v0 = vpop.permute.xlu0 %641 }
 0x452   : > { %v644_v2 = vmul.f32 %v642_v0, %v638_v63 }
 0x454   : > { %646 = vrot.lane.b32.xlu1 %v644_v2, %s1880_s26 }
 0x4c6   : > { %v647_v6 = vpop.permute.xlu1 %646 }
 0x4c7   : > { %v649_v8 = vadd.f32 %v647_v6, %v639_v3 }
 0x4c9   : > { %1765 = vtanh.f32 %v649_v8 }
 0x4d6   : > { %v1766_v10 = vpop.eup %1765 }
 0x4d7   : > { %652 = vrot.lane.b32.xlu0 %v1766_v10, %s1879_s25 }
 0x549   : > { %v653_v11 = vpop.permute.xlu0 %652 }
 0x54a   : > { %v655_v12 = vmul.f32 %v653_v11, %v638_v63 }
 0x54c   : > { %657 = vrot.lane.b32.xlu1 %v655_v12, %s1880_s26 }
 0x5be   : > { %v658_v13 = vpop.permute.xlu1 %657 }
 0x5bf   : > { %661 = vst.msk [vmem:[%s660_s15] sm:$0xff] %vm448_vm5, %v658_v13  ;;  %1651 = vmatmul.mubr.msk.f32.vlgmr.msra.gmra.mxu0 %vm448_vm5, %v658_v13  ;;  %v993_v13 = vld [vmem:[%s992_s0] sm:$0xff]  ;;  %s1541_s15 = sshll.u32 %s2071_s13, 3 }
 0x5c0   : > { %1665 = vmatpush3.msra.mxu0 %v1979_v4  ;;  %1672 = vmatprep.mubr.msk.f32.mxu0 %vm1878_vm1, %v1877_v1  ;;  %s1101_s16 = scalar_lea.vmem [#allocation2], %s1541_s15  ;;  %s1205_s13 = scalar_lea.vmem %s2097_s17, %s1541_s15 }
 0x5c1   : > { %1666 = vmatprep.subr.mxu0 %v1877_v1 }
 0x5c2   : > { %1667 = vmatpush3.msra.mxu0 %v1982_v5 }
 0x5c3   : > { %1668 = vmatprep.subr.mxu0 %v1877_v1 }
 0x5c4   : > { %1669 = vmatpush3.msra.mxu0 %v1988_v7 }
 0x5c5   : > { %1670 = vmatprep.subr.mxu0 %v1877_v1 }
 0x5c6   : > { %1671 = vmatpush3.msra.mxu0 %v1995_v9 }
 0x5c7   : > { %1686 = vmatprep.subr.mxu0 %v1877_v1 }
 0x67f   : > { %v735_v15 = vpop.f32.mrf.mxu0 }
 0x680   : > { %v739_v16 = vadd.f32 %v735_v15, %v666_v14 }
 0x681   : > { %v1652_v17 = vpop.f32.mrf.mxu0 }
 0x682   : > { %v1530_v18 = vmul.f32 -1.442695, %v739_v16 }
 0x684   : > { %1767 = vpow2.f32 %v1530_v18 }
 0x685   : > { %1769 = vtanh.f32 %v739_v16 }
 0x691   : > { %v1768_v19 = vpop.eup %1767 }
 0x692   : > { %v744_v20 = vadd.f32 1.0, %v1768_v19  ;;  %v1770_v21 = vpop.eup %1769 }
 0x694   : > { %1771 = vrcp.f32 %v744_v20 }
 0x6a1   : > { %v1772_v22 = vpop.eup %1771 }
 0x6a2   : > { %v747_v23 = vsel %vm2083_vm4, %v1770_v21, %v1772_v22 }
 0x6a3   : > { %750 = vrot.lane.b32.xlu0 %v747_v23, %s1879_s25  ;;  %v748_v26 = vmul.f32 %v747_v23, %v649_v8 }
 0x715   : > { %v751_v24 = vpop.permute.xlu0 %750 }
 0x716   : > { %v753_v25 = vmul.f32 %v751_v24, %v747_v23 }
 0x718   : > { %755 = vrot.lane.b32.xlu1 %v753_v25, %s1880_s26 }
 0x78a   : > { %v756_v27 = vpop.permute.xlu1 %755 }
 0x78b   : > { %v758_v28 = vadd.f32 %v756_v27, %v748_v26  ;;  %v1102_v27 = vld [vmem:[%s1101_s16] sm:$0xff] }
 0x78d   : > { %1773 = vtanh.f32 %v758_v28 }
 0x79a   : > { %v1774_v29 = vpop.eup %1773 }
 0x79b   : > { %761 = vrot.lane.b32.xlu0 %v1774_v29, %s1879_s25 }
 0x80d   : > { %v762_v30 = vpop.permute.xlu0 %761 }
 0x80e   : > { %v764_v31 = vmul.f32 %v762_v30, %v747_v23 }
 0x810   : > { %766 = vrot.lane.b32.xlu1 %v764_v31, %s1880_s26 }
 0x882   : > { %v767_v32 = vpop.permute.xlu1 %766 }
 0x883   : > { %770 = vst.msk [vmem:[%s769_s23] sm:$0xff] %vm448_vm5, %v767_v32  ;;  %1662 = vmatmul.mubr.msk.f32.vlgmr.msra.gmra.mxu1 %vm448_vm5, %v767_v32  ;;  %s1210_s23 = scalar_lea.vmem [#allocation2], %s1544_s9 }
 0x884   : > { %1676 = vmatpush3.msra.mxu1 %v1979_v4  ;;  %1683 = vmatprep.mubr.msk.f32.mxu1 %vm1878_vm1, %v1877_v1 }
 0x885   : > { %1677 = vmatprep.subr.mxu1 %v1877_v1 }
 0x886   : > { %1678 = vmatpush3.msra.mxu1 %v1982_v5 }
 0x887   : > { %1679 = vmatprep.subr.mxu1 %v1877_v1 }
 0x888   : > { %1680 = vmatpush3.msra.mxu1 %v1988_v7 }
 0x889   : > { %1681 = vmatprep.subr.mxu1 %v1877_v1 }
 0x88a   : > { %1682 = vmatpush3.msra.mxu1 %v1995_v9 }
 0x88b   : > { %1697 = vmatprep.subr.mxu1 %v1877_v1 }
 0x943   : > { %v844_v34 = vpop.f32.mrf.mxu1 }
 0x944   : > { %v848_v35 = vadd.f32 %v844_v34, %v775_v33 }
 0x945   : > { %v1663_v36 = vpop.f32.mrf.mxu1 }
 0x946   : > { %v1533_v37 = vmul.f32 -1.442695, %v848_v35 }
 0x948   : > { %1775 = vpow2.f32 %v1533_v37 }
 0x949   : > { %1777 = vtanh.f32 %v848_v35 }
 0x955   : > { %v1776_v38 = vpop.eup %1775 }
 0x956   : > { %v853_v39 = vadd.f32 1.0, %v1776_v38  ;;  %v1778_v40 = vpop.eup %1777 }
 0x958   : > { %1779 = vrcp.f32 %v853_v39 }
 0x965   : > { %v1780_v42 = vpop.eup %1779 }
 0x966   : > { %v856_v43 = vsel %vm2083_vm4, %v1778_v40, %v1780_v42 }
 0x967   : > { %859 = vrot.lane.b32.xlu0 %v856_v43, %s1879_s25  ;;  %v857_v46 = vmul.f32 %v856_v43, %v758_v28 }
 0x9d9   : > { %v860_v44 = vpop.permute.xlu0 %859 }
 0x9da   : > { %v862_v45 = vmul.f32 %v860_v44, %v856_v43 }
 0x9dc   : > { %864 = vrot.lane.b32.xlu1 %v862_v45, %s1880_s26 }
 0xa4e   : > { %v865_v47 = vpop.permute.xlu1 %864 }
 0xa4f   : > { %v867_v48 = vadd.f32 %v865_v47, %v857_v46  ;;  %v1211_v47 = vld [vmem:[%s1210_s23] sm:$0xff] }
 0xa51   : > { %1781 = vtanh.f32 %v867_v48 }
 0xa5e   : > { %v1782_v49 = vpop.eup %1781 }
 0xa5f   : > { %870 = vrot.lane.b32.xlu0 %v1782_v49, %s1879_s25 }
 0xad1   : > { %v871_v50 = vpop.permute.xlu0 %870 }
 0xad2   : > { %v873_v51 = vmul.f32 %v871_v50, %v856_v43 }
 0xad4   : > { %875 = vrot.lane.b32.xlu1 %v873_v51, %s1880_s26 }
 0xb46   : > { %v876_v52 = vpop.permute.xlu1 %875 }
 0xb47   : > { %879 = vst.msk [vmem:[%s878_s30] sm:$0xff] %vm448_vm5, %v876_v52  ;;  %1673 = vmatmul.mubr.msk.f32.vlgmr.msra.gmra.mxu0 %vm448_vm5, %v876_v52  ;;  %s1548_s30 = sshll.u32 %s1933_s22, 7  ;;  %s1323_s22 = scalar_lea.sflag [#allocation4], %s249_s6 }
 0xb48   : > { %1687 = vmatpush3.msra.mxu0 %v1979_v4  ;;  %1694 = vmatprep.mubr.msk.f32.mxu0 %vm1878_vm1, %v1877_v1 }
 0xb49   : > { %1688 = vmatprep.subr.mxu0 %v1877_v1 }
 0xb4a   : > { %1689 = vmatpush3.msra.mxu0 %v1982_v5 }
 0xb4b   : > { %1690 = vmatprep.subr.mxu0 %v1877_v1 }
 0xb4c   : > { %1691 = vmatpush3.msra.mxu0 %v1988_v7 }
 0xb4d   : > { %1692 = vmatprep.subr.mxu0 %v1877_v1 }
 0xb4e   : > { %1693 = vmatpush3.msra.mxu0 %v1995_v9 }
 0xc07   : > { %v953_v54 = vpop.f32.mrf.mxu0 }
 0xc08   : > { %v957_v55 = vadd.f32 %v953_v54, %v884_v53 }
 0xc09   : > { %v1674_v56 = vpop.f32.mrf.mxu0 }
 0xc0a   : > { %v1537_v57 = vmul.f32 -1.442695, %v957_v55 }
 0xc0c   : > { %1783 = vpow2.f32 %v1537_v57 }
 0xc0d   : > { %1785 = vtanh.f32 %v957_v55 }
 0xc19   : > { %v1784_v58 = vpop.eup %1783 }
 0xc1a   : > { %v962_v59 = vadd.f32 1.0, %v1784_v58  ;;  %v1786_v60 = vpop.eup %1785 }
 0xc1c   : > { %1787 = vrcp.f32 %v962_v59 }
 0xc29   : > { %v1788_v61 = vpop.eup %1787 }
 0xc2a   : > { %v965_v62 = vsel %vm2083_vm4, %v1786_v60, %v1788_v61 }
 0xc2b   : > { %968 = vrot.lane.b32.xlu0 %v965_v62, %s1879_s25  ;;  %v966_v2 = vmul.f32 %v965_v62, %v867_v48 }
 0xc9d   : > { %v969_v63 = vpop.permute.xlu0 %968 }
 0xc9e   : > { %v971_v0 = vmul.f32 %v969_v63, %v965_v62 }
 0xca0   : > { %973 = vrot.lane.b32.xlu1 %v971_v0, %s1880_s26 }
 0xd12   : > { %v974_v3 = vpop.permute.xlu1 %973 }
 0xd13   : > { %v976_v6 = vadd.f32 %v974_v3, %v966_v2 }
 0xd15   : > { %1789 = vtanh.f32 %v976_v6 }
 0xd22   : > { %v1790_v8 = vpop.eup %1789 }
 0xd23   : > { %979 = vrot.lane.b32.xlu0 %v1790_v8, %s1879_s25 }
 0xd95   : > { %v980_v10 = vpop.permute.xlu0 %979 }
 0xd96   : > { %v982_v11 = vmul.f32 %v980_v10, %v965_v62 }
 0xd98   : > { %984 = vrot.lane.b32.xlu1 %v982_v11, %s1880_s26 }
 0xe0a   : > { %v985_v12 = vpop.permute.xlu1 %984 }
 0xe0b   : > { %988 = vst.msk [vmem:[%s987_s8] sm:$0xff] %vm448_vm5, %v985_v12  ;;  %1684 = vmatmul.mubr.msk.f32.vlgmr.msra.gmra.mxu1 %vm448_vm5, %v985_v12  ;;  %s1314_s8 = scalar_lea.vmem %s2097_s17, %s1544_s9 }
 0xe0c   : > { %1698 = vmatpush3.msra.mxu1 %v1979_v4  ;;  %1705 = vmatprep.mubr.msk.f32.mxu1 %vm1878_vm1, %v1877_v1 }
 0xe0d   : > { %1699 = vmatprep.subr.mxu1 %v1877_v1 }
 0xe0e   : > { %1700 = vmatpush3.msra.mxu1 %v1982_v5 }
 0xe0f   : > { %1701 = vmatprep.subr.mxu1 %v1877_v1 }
 0xe10   : > { %1702 = vmatpush3.msra.mxu1 %v1988_v7 }
 0xe11   : > { %1703 = vmatprep.subr.mxu1 %v1877_v1 }
 0xe12   : > { %1704 = vmatpush3.msra.mxu1 %v1995_v9 }
 0xecb   : > { %v1062_v14 = vpop.f32.mrf.mxu1 }
 0xecc   : > { %v1066_v4 = vadd.f32 %v1062_v14, %v993_v13 }
 0xecd   : > { %v1685_v15 = vpop.f32.mrf.mxu1 }
 0xece   : > { %v1540_v16 = vmul.f32 -1.442695, %v1066_v4 }
 0xed0   : > { %1791 = vpow2.f32 %v1540_v16 }
 0xed1   : > { %1793 = vtanh.f32 %v1066_v4 }
 0xedd   : > { %v1792_v17 = vpop.eup %1791 }
 0xede   : > { %v1071_v18 = vadd.f32 1.0, %v1792_v17  ;;  %v1794_v5 = vpop.eup %1793 }
 0xee0   : > { %1795 = vrcp.f32 %v1071_v18 }
 0xeed   : > { %v1796_v19 = vpop.eup %1795 }
 0xeee   : > { %v1074_v1 = vsel %vm2083_vm4, %v1794_v5, %v1796_v19 }
 0xeef   : > { %1077 = vrot.lane.b32.xlu0 %v1074_v1, %s1879_s25  ;;  %v1075_v20 = vmul.f32 %v1074_v1, %v976_v6 }
 0xf61   : > { %v1078_v7 = vpop.permute.xlu0 %1077 }
 0xf62   : > { %v1080_v9 = vmul.f32 %v1078_v7, %v1074_v1 }
 0xf64   : > { %1082 = vrot.lane.b32.xlu1 %v1080_v9, %s1880_s26 }
 0xfd6   : > { %v1083_v21 = vpop.permute.xlu1 %1082 }
 0xfd7   : > { %v1085_v22 = vadd.f32 %v1083_v21, %v1075_v20 }
 0xfd9   : > { %1797 = vtanh.f32 %v1085_v22 }
 0xfe6   : > { %v1798_v23 = vpop.eup %1797 }
 0xfe7   : > { %1088 = vrot.lane.b32.xlu0 %v1798_v23, %s1879_s25 }
0x1059   : > { %v1089_v24 = vpop.permute.xlu0 %1088 }
0x105a   : > { %v1091_v25 = vmul.f32 %v1089_v24, %v1074_v1 }
0x105c   : > { %1093 = vrot.lane.b32.xlu1 %v1091_v25, %s1880_s26 }
0x10ce   : > { %v1094_v26 = vpop.permute.xlu1 %1093 }
0x10cf   : > { %1097 = vst.msk [vmem:[%s1096_s10] sm:$0xff] %vm448_vm5, %v1094_v26  ;;  %1695 = vmatmul.mubr.msk.f32.vlgmr.msra.gmra.mxu0 %vm448_vm5, %v1094_v26  ;;  %s2235_s10 = scalar_lea.hbm %s2283_s5, %s1548_s30 }
0x118f   : > { %v1171_v28 = vpop.f32.mrf.mxu0 }
0x1190   : > { %v1175_v29 = vadd.f32 %v1171_v28, %v1102_v27 }
0x1191   : > { %v1696_v30 = vpop.f32.mrf.mxu0 }
0x1192   : > { %v1543_v31 = vmul.f32 -1.442695, %v1175_v29 }
0x1194   : > { %1799 = vpow2.f32 %v1543_v31 }
0x1195   : > { %1801 = vtanh.f32 %v1175_v29 }
0x11a1   : > { %v1800_v32 = vpop.eup %1799 }
0x11a2   : > { %v1180_v33 = vadd.f32 1.0, %v1800_v32  ;;  %v1802_v34 = vpop.eup %1801 }
0x11a4   : > { %1803 = vrcp.f32 %v1180_v33 }
0x11b1   : > { %v1804_v35 = vpop.eup %1803 }
0x11b2   : > { %v1183_v36 = vsel %vm2083_vm4, %v1802_v34, %v1804_v35 }
0x11b3   : > { %1186 = vrot.lane.b32.xlu0 %v1183_v36, %s1879_s25  ;;  %v1184_v39 = vmul.f32 %v1183_v36, %v1085_v22 }
0x1225   : > { %v1187_v37 = vpop.permute.xlu0 %1186 }
0x1226   : > { %v1189_v38 = vmul.f32 %v1187_v37, %v1183_v36 }
0x1228   : > { %1191 = vrot.lane.b32.xlu1 %v1189_v38, %s1880_s26 }
0x129a   : > { %v1192_v40 = vpop.permute.xlu1 %1191 }
0x129b   : > { %v1194_v42 = vadd.f32 %v1192_v40, %v1184_v39 }
0x129d   : > { %1805 = vtanh.f32 %v1194_v42 }
0x12aa   : > { %v1806_v43 = vpop.eup %1805 }
0x12ab   : > { %1197 = vrot.lane.b32.xlu0 %v1806_v43, %s1879_s25 }
0x131d   : > { %v1198_v44 = vpop.permute.xlu0 %1197 }
0x131e   : > { %v1200_v45 = vmul.f32 %v1198_v44, %v1183_v36 }
0x1320   : > { %1202 = vrot.lane.b32.xlu1 %v1200_v45, %s1880_s26 }
0x1392   : > { %v1203_v46 = vpop.permute.xlu1 %1202 }
0x1393   : > { %1206 = vst.msk [vmem:[%s1205_s13] sm:$0xff] %vm448_vm5, %v1203_v46  ;;  %1706 = vmatmul.mubr.msk.f32.vlgmr.msra.gmra.mxu1 %vm448_vm5, %v1203_v46 }
0x1453   : > { %v1280_v48 = vpop.f32.mrf.mxu1 }
0x1454   : > { %v1284_v49 = vadd.f32 %v1280_v48, %v1211_v47 }
0x1455   : > { %v1707_v50 = vpop.f32.mrf.mxu1 }
0x1456   : > { %v1546_v51 = vmul.f32 -1.442695, %v1284_v49 }
0x1458   : > { %1807 = vpow2.f32 %v1546_v51 }
0x1459   : > { %1809 = vtanh.f32 %v1284_v49 }
0x1465   : > { %v1808_v52 = vpop.eup %1807 }
0x1466   : > { %v1289_v53 = vadd.f32 1.0, %v1808_v52  ;;  %v1810_v54 = vpop.eup %1809 }
0x1468   : > { %1811 = vrcp.f32 %v1289_v53 }
0x1475   : > { %v1812_v55 = vpop.eup %1811 }
0x1476   : > { %v1292_v56 = vsel %vm2083_vm4, %v1810_v54, %v1812_v55 }
0x1477   : > { %1295 = vrot.lane.b32.xlu0 %v1292_v56, %s1879_s25  ;;  %v1293_v59 = vmul.f32 %v1292_v56, %v1194_v42 }
0x14e9   : > { %v1296_v57 = vpop.permute.xlu0 %1295 }
0x14ea   : > { %v1298_v58 = vmul.f32 %v1296_v57, %v1292_v56 }
0x14ec   : > { %1300 = vrot.lane.b32.xlu1 %v1298_v58, %s1880_s26 }
0x155e   : > { %v1301_v60 = vpop.permute.xlu1 %1300 }
0x155f   : > { %v1303_v61 = vadd.f32 %v1301_v60, %v1293_v59 }
0x1561   : > { %1813 = vtanh.f32 %v1303_v61 }
0x156e   : > { %v1814_v62 = vpop.eup %1813 }
0x156f   : > { %1306 = vrot.lane.b32.xlu0 %v1814_v62, %s1879_s25  ;;  %s1815_s25 = scalar_lea.vmem %s2237_s1, 128 }
0x1570   : > { %p1816_p12 = scmp.ne.s32.totalorder %s2237_s1, %s1815_s25 }
0x1572   : > { %p1817_p13 = pnand %p1816_p12, %p1950_p5 }
0x1574   : > { %p1818_p0 = pneg %p1817_p13 }
0x15e1   : > { %v1307_v63 = vpop.permute.xlu0 %1306 }
0x15e2   : > { %v1309_v0 = vmul.f32 %v1307_v63, %v1292_v56 }
0x15e4   : > { %1311 = vrot.lane.b32.xlu1 %v1309_v0, %s1880_s26  ;;  %s1819_s26 = sshll.u32 %s1881_s14, 4  ;;  %s1820_s26 = int_to_ptr.vmem [resolvable:$false] %s1819_s26 }
0x15e5   : > { %s1821_s17 = scalar_lea.vmem %s1820_s26, 256  ;;  %p1822_p1 = scmp.lt.s32.totalorder %s2237_s1, %s1820_s26 }
0x15e6   : > { %p1823_p2 = scmp.lt.s32.totalorder %s1821_s17, %s1815_s25 }
0x15e8   : > { %p1824_p3 = por %p1823_p2, %p1822_p1 }
0x15ea   : > { %p1825_p4 = pnand %p1824_p3, %p1818_p0 }
0x1656   : > { %v1312_v41 = vpop.permute.xlu1 %1311 }
0x1657   : > { %1315 = vst.msk [vmem:[%s1314_s8] sm:$0xff] %vm448_vm5, %v1312_v41  ;;  %1316 = vst.msk [vmem:[%s251_s12] sm:$0xff] %vm448_vm5, %v1312_v41 }
0x1658   : > { %1828 = shalt.err (!%p1825_p4)
}
0x1659   : > { %s1829_s15 = scalar_lea.hbm %s2235_s10, 128  ;;  %s1833_s9 = scalar_lea.hbm %s2283_s5, 256 }
0x165a   : > { %p1830_p7 = scmp.ne.s32.totalorder %s2235_s10, %s1829_s15  ;;  %p1834_p10 = scmp.lt.s32.totalorder %s2235_s10, %s2283_s5 }
0x165b   : > { %p1835_p11 = scmp.lt.s32.totalorder %s1833_s9, %s1829_s15 }
0x165c   : > { %p1831_p8 = pnand %p1830_p7, %p1950_p5 }
0x165d   : > { %p1836_p12 = por %p1835_p11, %p1834_p10 }
0x165e   : > { %p1832_p9 = pneg %p1831_p8 }
0x1660   : > { %p1837_p13 = pnand %p1836_p12, %p1832_p9 }
0x1662   : > { %1840 = shalt.err (!%p1837_p13)
}
0x1663   : > { %1708 = dma.vmem_to_hbm [thread:$0]  (%p1950_p5), %s2237_s1, 128, %s2235_s10, %s1323_s22  }
0x1664 PF: > { %p1714_p0 = scmp.ge.s32.totalorder %s1875_s21, 2  ;;  %s1359_s11 = sand.u32 1, %s1863_s18  }
0x1665   : > { %s1360_s30 = scalar_lea.sflag [#allocation4], %s1359_s11 }
0x1666   : > { %p1711_p1 = pnand %p1714_p0, %p1954_p6 }
0x1668   : > { %p1712_p2 = pneg %p1711_p1 }
0x166a   : > { %1858 = dma.done.wait (%p1712_p2), %s1360_s30, 128  }
0x166b   : > { %1860 = vsyncadd (%p1712_p2), %s1360_s30, 4294967168  ;;  %p16_p3 = scmp.ge.s32.totalorder %s1937_s24, 4   ;;  %s2292_s18 = smov %s1867_s19 }
0x166c   : > { %s2293_s19 = smov %s1871_s20  ;;  %s2294_s20 = smov %s1948_s27 }
0x166d   : > { %s2295_s21 = smov %s1937_s24  ;;  %18 = sbr.rel (!%p16_p3) target bundleno = 6 (0x6), region = 105 }
0x1672   :  { %1365 = vsyncpa [#allocation4], 1 }
0x1673   :  { %1367 = vsyncpa [#allocation4 + $0x1], 1 }

// kernel: multi_lstm_forward.3
= control target key start
LH: loop header
LB: loop body
LE: loop exit
PB: predicated region body
PF: predicated region fallthrough
CT: control target
= control target key end

     0   :  { %s2523_s0 = inlined_call_operand.vmem [shape: f32[2,8,8,32], index: 0, kind: input, shape index: {}]   ;;  %s2524_s1 = inlined_call_operand.vmem [shape: f32[2,64,128], index: 1, kind: input, shape index: {}]   ;;  %s2525_s2 = inlined_call_operand.vmem [shape: f32[2,32,128], index: 2, kind: input, shape index: {}]   ;;  %s2526_s3 = inlined_call_operand.vmem [shape: f32[2,1,128], index: 3, kind: input, shape index: {}]   ;;  %s2527_s4 = inlined_call_operand.hbm [shape: f32[2,8,8,32], index: 4, kind: output, shape index: {0}]   ;;  %s2528_s5 = inlined_call_operand.vmem [shape: f32[2,8,32], index: 5, kind: output, shape index: {1}]  }
   0x1   :  { %2529 = sst [smem:[#allocation6_spill]] %s2523_s0 }
   0x2   :  { %2530 = sst [smem:[#allocation7_spill]] %s2524_s1 }
   0x3   :  { %11 = vsyncpa [#allocation4], 0 }
   0x4   :  { %13 = vsyncpa [#allocation4 + $0x1], 0  ;;  %s2111_s18 = smov 0   ;;  %s2113_s19 = smov 0  }
   0x5   :  { %s2115_s20 = smov 0   ;;  %s2117_s21 = smov 0  }
   0x6 LB: > { %s2132_s22 = sadd.s32 4294967295, %s2072_s21   ;;  %s1651_s23 = sadd.s32 4294967294, %s2072_s21   ;;  %s2072_s21 = sphi %s2117_s21, %s2540_s21   ;;  %s2068_s20 = sphi %s2115_s20, %s2539_s20   ;;  %s2064_s19 = sphi %s2113_s19, %s2538_s19   ;;  %s2060_s18 = sphi %s2111_s18, %s2537_s18  }
   0x7   : > { %s2136_s24 = sadd.s32 1, %s2072_s21   ;;  %s125_s25 = sadd.s32 1, %s2068_s20 }
   0x8   : > { %s122_s26 = ssub.s32 %s2072_s21, %s2136_s24  ;;  %p135_p0 = scmp.ne.s32.totalorder %s2068_s20, %s2064_s19 }
   0x9   : > { %p123_p1 = scmp.eq.s32.totalorder %s122_s26, 0  ;;  %p136_p2 = scmp.eq.s32.totalorder %s2132_s22, 1 }
   0xa   : > { %p141_p3 = scmp.ne.s32.totalorder %s2064_s19, %s2060_s18  ;;  %p142_p4 = scmp.eq.s32.totalorder %s1651_s23, 1 }
   0xb   : > { %s2147_s27 = scalar_select %p123_p1, %s2068_s20, %s125_s25  }
   0xc   : > { %p2149_p5 = por %p136_p2, %p135_p0  ;;  %p2153_p6 = por %p142_p4, %p141_p3 }
   0xd   : > { %p1654_p7 = scmp.ge.s32.totalorder %s2072_s21, 1  ;;  %p211_p8 = scmp.lt.s32.totalorder %s2072_s21, 3 }
   0xf   : > { %p212_p9 = pnand %p1654_p7, %p211_p8 }
  0x10   : > { %p251_p10 = scmp.lt.s32.totalorder (!%p212_p9), %s2132_s22, 1  ;;  %s2533_s0 = sld [smem:[#allocation6_spill]] (!%p212_p9) }
  0x11   : > { %215 = sbr.rel (%p212_p9) target bundleno = 5739 (0x166b), region = 36  ;;  %s2534_s1 = sld [smem:[#allocation7_spill]] (!%p212_p9) }
  0x12   : > { %p582_p11 = scmp.eq.s32.totalorder (!%p212_p9), %s2132_s22, 0 }
  0x16   : > { %v268_v0 = vld [vmem:[%s2533_s0] sm:$0xff]  ;;  %vm289_vm0 = vcmask 261120   ;;  %s2169_s9 = scalar_select %p251_p10, %s2132_s22, 1  ;;  %v269_v10 = vld [vmem:[%s2533_s0 + $0x8] sm:$0xff]  ;;  %v270_v12 = vld [vmem:[%s2533_s0 + $0x10] sm:$0xff]  ;;  %v2074_v19 = vmov 0.0  }
  0x17   : > { %v276_v1 = vld [vmem:[%s2533_s0 + $0x40] sm:$0xff]  ;;  %1783 = vmatprep.mubr.msk.f32.mxu0 %vm289_vm0, %v268_v0  ;;  %v277_v11 = vld [vmem:[%s2533_s0 + $0x48] sm:$0xff]  ;;  %v278_v13 = vld [vmem:[%s2533_s0 + $0x50] sm:$0xff]  ;;  %vm2075_vm1 = vmmov 0   ;;  %s2285_s17 = scalar_select %p582_p11, 0, 7 }
  0x18   : > { %1803 = vmatprep.mubr.msk.f32.mxu1 %vm289_vm0, %v276_v1  ;;  %s1708_s10 = sshll.u32 %s2169_s9, 6  ;;  %s1709_s14 = sshll.u32 %s2169_s9, 5  ;;  %v271_v15 = vld [vmem:[%s2533_s0 + $0x18] sm:$0xff]  ;;  %v272_v17 = vld [vmem:[%s2533_s0 + $0x20] sm:$0xff]  ;;  %v273_v21 = vld [vmem:[%s2533_s0 + $0x28] sm:$0xff] }
  0x19   : > { %s255_s13 = scalar_lea.vmem %s2534_s1, %s1708_s10  ;;  %s2185_s30 = scalar_lea.vmem %s2525_s2, %s1709_s14  ;;  %v279_v16 = vld [vmem:[%s2533_s0 + $0x58] sm:$0xff]  ;;  %v280_v18 = vld [vmem:[%s2533_s0 + $0x60] sm:$0xff]  ;;  %v281_v22 = vld [vmem:[%s2533_s0 + $0x68] sm:$0xff] }
  0x1a   : > { %v288_v2 = vld [vmem:[%s255_s13 + $0x18] sm:$0xff]  ;;  %v287_v4 = vld [vmem:[%s255_s13 + $0x10] sm:$0xff]  ;;  %v286_v6 = vld [vmem:[%s255_s13 + $0x8] sm:$0xff] }
  0x1b   : > { %v436_v3 = vld [vmem:[%s255_s13 + $0x38] sm:$0xff]  ;;  %1775 = vmatprep.subr.mxu0 %v288_v2  ;;  %v435_v5 = vld [vmem:[%s255_s13 + $0x30] sm:$0xff]  ;;  %v434_v7 = vld [vmem:[%s255_s13 + $0x28] sm:$0xff] }
  0x1c   : > { %1795 = vmatprep.subr.mxu1 %v436_v3  ;;  %1776 = vmatpush3.msra.mxu0 %v288_v2  ;;  %v285_v8 = vld [vmem:[%s255_s13] sm:$0xff]  ;;  %v2196_v14 = vld [vmem:[%s2185_s30 + $0x18] sm:$0xff]  ;;  %v2219_v20 = vld [vmem:[%s2185_s30 + $0x10] sm:$0xff] }
  0x1d   : > { %1796 = vmatpush3.msra.mxu1 %v436_v3  ;;  %1777 = vmatprep.subr.mxu0 %v287_v4  ;;  %v433_v9 = vld [vmem:[%s255_s13 + $0x20] sm:$0xff]  ;;  %v274_v23 = vld [vmem:[%s2533_s0 + $0x30] sm:$0xff]  ;;  %v2242_v25 = vld [vmem:[%s2185_s30 + $0x8] sm:$0xff] }
  0x1e   : > { %1797 = vmatprep.subr.mxu1 %v435_v5  ;;  %1778 = vmatpush3.msra.mxu0 %v287_v4  ;;  %v282_v24 = vld [vmem:[%s2533_s0 + $0x70] sm:$0xff]  ;;  %v275_v26 = vld [vmem:[%s2533_s0 + $0x38] sm:$0xff]  ;;  %v2256_v28 = vld [vmem:[%s2185_s30] sm:$0xff]  ;;  %s2283_s30 = scalar_select %p582_p11, 1, 4294967295 }
  0x1f   : > { %1798 = vmatpush3.msra.mxu1 %v435_v5  ;;  %1779 = vmatprep.subr.mxu0 %v286_v6  ;;  %v283_v27 = vld [vmem:[%s2533_s0 + $0x78] sm:$0xff]  ;;  %s1678_s0 = sshll.u32 %s2285_s17, 3  ;;  %v589_v5 = vlaneseq }
  0x20   : > { %1799 = vmatprep.subr.mxu1 %v434_v7  ;;  %1780 = vmatpush3.msra.mxu0 %v286_v6  ;;  %s1683_s23 = sshll.u32 %s2283_s30, 1  ;;  %s919_s26 = smul.u32 3, %s2283_s30 }
  0x21   : > { %1800 = vmatpush3.msra.mxu1 %v434_v7  ;;  %1781 = vmatprep.subr.mxu0 %v285_v8  ;;  %s2289_s25 = sadd.s32 %s1683_s23, %s2285_s17  ;;  %s1690_s6 = sshll.u32 %s2283_s30, 2  ;;  %v590_v6 = vand.u32 127, %v589_v5 }
  0x22   : > { %1801 = vmatprep.subr.mxu1 %v433_v9  ;;  %1782 = vmatpush3.msra.mxu0 %v285_v8  ;;  %s2294_s7 = sadd.s32 %s919_s26, %s2285_s17  ;;  %s1137_s8 = smul.u32 5, %s2283_s30 }
  0x23   : > { %1802 = vmatpush3.msra.mxu1 %v433_v9  ;;  %1784 = vmatmul.mubr.msk.f32.vlgmr.msra.gmra.mxu0 %vm289_vm0, %v269_v10  ;;  %s2298_s10 = sadd.s32 %s1690_s6, %s2285_s17  ;;  %s702_s11 = sadd.s32 %s2283_s30, %s2285_s17  ;;  %vm591_vm2 = vcmp.ge.s32.totalorder %v590_v6, 64  ;;  %vm592_vm3 = vcmp.lt.s32.totalorder %v590_v6, 96 }
  0x24   : > { %1804 = vmatmul.mubr.msk.f32.vlgmr.msra.gmra.mxu1 %vm289_vm0, %v277_v11  ;;  %1786 = vmatprep.mubr.msk.f32.mxu0 %vm289_vm0, %v270_v12  ;;  %s2303_s12 = sadd.s32 %s1137_s8, %s2285_s17  ;;  %s1246_s13 = smul.u32 6, %s2283_s30  ;;  %vm2320_vm4 = vmand %vm591_vm2, %vm592_vm3 }
  0x25   : > { %1806 = vmatprep.mubr.msk.f32.mxu1 %vm289_vm0, %v278_v13  ;;  %1815 = vmatprep.subr.mxu0 %v2074_v19  ;;  %s1355_s14 = smul.u32 7, %s2283_s30  ;;  %s263_s23 = scalar_lea.vmem %s2526_s3, %s2169_s9 }
  0x26   : > { %1826 = vmatprep.subr.mxu1 %v2074_v19  ;;  %1816 = vmatpush3.msra.mxu0 %v2196_v14  ;;  %s2308_s15 = sadd.s32 %s1246_s13, %s2285_s17  ;;  %v1669_v29 = vld [vmem:[%s263_s23] ss:$0 sm:$0xff]  ;;  %s595_s1 = scalar_lea.vmem [#allocation2], %s1678_s0 }
  0x27   : > { %1827 = vmatpush3.msra.mxu1 %v2196_v14  ;;  %1787 = vmatmul.mubr.msk.f32.gmra.mxu0 %vm289_vm0, %v271_v15  ;;  %s2311_s16 = sadd.s32 %s1355_s14, %s2285_s17  ;;  %s2076_s26 = smov 64  }
  0x28   : > { %1807 = vmatmul.mubr.msk.f32.gmra.mxu1 %vm289_vm0, %v279_v16  ;;  %1789 = vmatprep.mubr.msk.f32.mxu0 %vm289_vm0, %v272_v17  ;;  %s2077_s6 = smov 32   ;;  %s242_s8 = sand.u32 1, %s2064_s19  }
  0x29   : > { %1809 = vmatprep.mubr.msk.f32.mxu1 %vm289_vm0, %v280_v18  ;;  %1817 = vmatprep.subr.mxu0 %v2074_v19  ;;  %s1655_s13 = sshll.u32 %s242_s8, 6  ;;  %s1684_s17 = sshll.u32 %s2289_s25, 3 }
  0x2a   : > { %1828 = vmatprep.subr.mxu1 %v2074_v19  ;;  %1818 = vmatpush3.msra.mxu0 %v2219_v20  ;;  %s2333_s14 = scalar_lea.vmem [#allocation3], %s1655_s13  ;;  %s1687_s13 = sshll.u32 %s2294_s7, 3 }
  0x2b   : > { %1829 = vmatpush3.msra.mxu1 %v2219_v20  ;;  %1790 = vmatmul.mubr.msk.f32.gmra.mxu0 %vm289_vm0, %v273_v21  ;;  %s700_s23 = scalar_lea.vmem %s2333_s14, %s1678_s0 [#allocation3]  ;;  %s2353_s0 = sshll.u32 %s702_s11, 3 }
  0x2c   : > { %1810 = vmatmul.mubr.msk.f32.gmra.mxu1 %vm289_vm0, %v281_v22  ;;  %1792 = vmatprep.mubr.msk.f32.mxu0 %vm289_vm0, %v274_v23  ;;  %s808_s30 = scalar_lea.vmem %s2333_s14, %s2353_s0 [#allocation3]  ;;  %s813_s11 = scalar_lea.vmem [#allocation2], %s1684_s17 }
  0x2d   : > { %1812 = vmatprep.mubr.msk.f32.mxu1 %vm289_vm0, %v282_v24  ;;  %1819 = vmatprep.subr.mxu0 %v2074_v19  ;;  %s917_s25 = scalar_lea.vmem %s2333_s14, %s1684_s17 [#allocation3]  ;;  %s1026_s7 = scalar_lea.vmem %s2333_s14, %s1687_s13 [#allocation3] }
  0x2e   : > { %1830 = vmatprep.subr.mxu1 %v2074_v19  ;;  %1820 = vmatpush3.msra.mxu0 %v2242_v25 }
  0x2f   : > { %1831 = vmatpush3.msra.mxu1 %v2242_v25  ;;  %1793 = vmatmul.mubr.msk.f32.gmra.mxu0 %vm289_vm0, %v275_v26 }
  0x30   : > { %1813 = vmatmul.mubr.msk.f32.gmra.mxu1 %vm289_vm0, %v283_v27  ;;  %1821 = vmatprep.subr.mxu0 %v2074_v19 }
  0x31   : > { %1823 = vmatprep.mubr.msk.f32.mxu0 %vm2075_vm1, %v2074_v19  ;;  %1822 = vmatpush3.msra.mxu0 %v2256_v28 }
  0x32   : > { %1832 = vmatprep.subr.mxu1 %v2074_v19  ;;  %1834 = vmatprep.mubr.msk.f32.mxu1 %vm2075_vm1, %v2074_v19 }
  0x33   : > { %1833 = vmatpush3.msra.mxu1 %v2256_v28  ;;  %1824 = vmatmul.mubr.f32.vlgmr.msra.gmra.mxu0 %v2074_v19 }
  0x34   : > { %1837 = vmatprep.subr.mxu0 %v2074_v19  ;;  %1845 = vmatprep.mubr.msk.f32.mxu0 %vm2075_vm1, %v2074_v19 }
  0x35   : > { %1838 = vmatpush3.msra.mxu0 %v2196_v14  ;;  %1848 = vmatprep.subr.mxu1 %v2074_v19 }
  0x36   : > { %1839 = vmatprep.subr.mxu0 %v2074_v19 }
  0x37   : > { %1840 = vmatpush3.msra.mxu0 %v2219_v20 }
  0x38   : > { %1841 = vmatprep.subr.mxu0 %v2074_v19 }
  0x39   : > { %1842 = vmatpush3.msra.mxu0 %v2242_v25 }
  0x3a   : > { %1843 = vmatprep.subr.mxu0 %v2074_v19 }
  0x3b   : > { %1844 = vmatpush3.msra.mxu0 %v2256_v28 }
  0x3c   : > { %1859 = vmatprep.subr.mxu0 %v2074_v19 }
  0xe3   : > { %v1785_v30 = vpop.f32.mrf.mxu0 }
  0xe4   : > { %v1805_v31 = vpop.f32.mrf.mxu1  ;;  %v426_v32 = vadd.f32 %v1785_v30, %v1669_v29 }
  0xe5   : > { %v380_v33 = vpop.f32.mrf.mxu0 }
  0xe6   : > { %v527_v34 = vpop.f32.mrf.mxu1  ;;  %v567_v35 = vadd.f32 %v1805_v31, %v426_v32  ;;  %v425_v36 = vadd.f32 %v1669_v29, %v380_v33 }
  0xe7   : > { %v1788_v37 = vpop.f32.mrf.mxu0 }
  0xe8   : > { %v1808_v38 = vpop.f32.mrf.mxu1  ;;  %575 = vst [vmem:[#allocation2 + $0x8] sm:$0xff] %v567_v35  ;;  %v566_v39 = vadd.f32 %v527_v34, %v425_v36  ;;  %v428_v40 = vadd.f32 %v1788_v37, %v1669_v29 }
  0xe9   : > { %v390_v41 = vpop.f32.mrf.mxu0 }
  0xea   : > { %v537_v42 = vpop.f32.mrf.mxu1  ;;  %574 = vst [vmem:[#allocation2] sm:$0xff] %v566_v39  ;;  %v569_v43 = vadd.f32 %v1808_v38, %v428_v40  ;;  %v427_v44 = vadd.f32 %v1669_v29, %v390_v41 }
  0xeb   : > { %v1791_v45 = vpop.f32.mrf.mxu0 }
  0xec   : > { %v1811_v46 = vpop.f32.mrf.mxu1  ;;  %577 = vst [vmem:[#allocation2 + $0x18] sm:$0xff] %v569_v43  ;;  %v568_v47 = vadd.f32 %v537_v42, %v427_v44  ;;  %v430_v48 = vadd.f32 %v1791_v45, %v1669_v29 }
  0xed   : > { %v400_v49 = vpop.f32.mrf.mxu0 }
  0xee   : > { %v547_v50 = vpop.f32.mrf.mxu1  ;;  %576 = vst [vmem:[#allocation2 + $0x10] sm:$0xff] %v568_v47  ;;  %v571_v51 = vadd.f32 %v1811_v46, %v430_v48  ;;  %v429_v52 = vadd.f32 %v1669_v29, %v400_v49 }
  0xef   : > { %v1794_v53 = vpop.f32.mrf.mxu0 }
  0xf0   : > { %v1814_v54 = vpop.f32.mrf.mxu1  ;;  %579 = vst [vmem:[#allocation2 + $0x28] sm:$0xff] %v571_v51  ;;  %v570_v55 = vadd.f32 %v547_v50, %v429_v52  ;;  %v432_v56 = vadd.f32 %v1794_v53, %v1669_v29 }
  0xf1   : > { %v410_v57 = vpop.f32.mrf.mxu0 }
  0xf2   : > { %578 = vst [vmem:[#allocation2 + $0x20] sm:$0xff] %v570_v55  ;;  %v573_v58 = vadd.f32 %v1814_v54, %v432_v56  ;;  %v431_v59 = vadd.f32 %v1669_v29, %v410_v57  ;;  %v557_v60 = vpop.f32.mrf.mxu1 }
  0xf3   : > { %v666_v61 = vpop.f32.mrf.mxu0 }
  0xf4   : > { %581 = vst [vmem:[#allocation2 + $0x38] sm:$0xff] %v573_v58  ;;  %v572_v62 = vadd.f32 %v557_v60, %v431_v59 }
  0xf5   : > { %v1825_v63 = vpop.f32.mrf.mxu0 }
  0xf6   : > { %580 = vst [vmem:[#allocation2 + $0x30] sm:$0xff] %v572_v62 }
  0xfd   : > { %v596_v0 = vld [vmem:[%s595_s1] sm:$0xff]  ;;  %s704_s1 = scalar_lea.vmem [#allocation2], %s2353_s0  ;;  %s1691_s0 = sshll.u32 %s2298_s10, 3 }
  0xfe   : > { %v670_v1 = vadd.f32 %v666_v61, %v596_v0  ;;  %v705_v23 = vld [vmem:[%s704_s1] sm:$0xff]  ;;  %s1031_s1 = scalar_lea.vmem [#allocation2], %s1691_s0  ;;  %s1135_s10 = scalar_lea.vmem %s2333_s14, %s1691_s0 [#allocation3] }
  0xff   : > { %v814_v44 = vld [vmem:[%s813_s11] sm:$0xff]  ;;  %s1697_s11 = sshll.u32 %s2308_s15, 3  ;;  %s1710_s0 = sshll.u32 %s2132_s22, 10 }
 0x100   : > { %v1679_v2 = vmul.f32 -1.442695, %v670_v1  ;;  %s1353_s15 = scalar_lea.vmem %s2333_s14, %s1697_s11 [#allocation3]  ;;  %s2483_s22 = scalar_lea.sflag [#allocation4], %s242_s8 }
 0x102   : > { %1948 = vpow2.f32 %v1679_v2 }
 0x103   : > { %1950 = vtanh.f32 %v670_v1 }
 0x10f   : > { %v1949_v3 = vpop.eup %1948 }
 0x110   : > { %v675_v4 = vadd.f32 1.0, %v1949_v3  ;;  %v1951_v8 = vpop.eup %1950 }
 0x112   : > { %1952 = vrcp.f32 %v675_v4 }
 0x11f   : > { %v1953_v9 = vpop.eup %1952 }
 0x120   : > { %v678_v10 = vsel %vm2320_vm4, %v1951_v8, %v1953_v9 }
 0x121   : > { %681 = vrot.lane.b32.xlu0 %v678_v10, %s2076_s26  ;;  %v679_v13 = vmul.f32 0.0, %v678_v10 }
 0x193   : > { %v682_v11 = vpop.permute.xlu0 %681 }
 0x194   : > { %v684_v12 = vmul.f32 %v682_v11, %v678_v10 }
 0x196   : > { %686 = vrot.lane.b32.xlu0 %v684_v12, %s2077_s6 }
 0x208   : > { %v687_v15 = vpop.permute.xlu0 %686 }
 0x209   : > { %v689_v16 = vadd.f32 %v687_v15, %v679_v13 }
 0x20b   : > { %1954 = vtanh.f32 %v689_v16 }
 0x218   : > { %v1955_v17 = vpop.eup %1954 }
 0x219   : > { %692 = vrot.lane.b32.xlu1 %v1955_v17, %s2076_s26 }
 0x28b   : > { %v693_v18 = vpop.permute.xlu1 %692 }
 0x28c   : > { %v695_v21 = vmul.f32 %v693_v18, %v678_v10 }
 0x28e   : > { %697 = vrot.lane.b32.xlu1 %v695_v21, %s2077_s6 }
 0x300   : > { %v698_v22 = vpop.permute.xlu1 %697 }
 0x301   : > { %701 = vst.msk [vmem:[%s700_s23] sm:$0xff] %vm289_vm0, %v698_v22  ;;  %1835 = vmatmul.mubr.msk.f32.vlgmr.msra.gmra.mxu1 %vm289_vm0, %v698_v22  ;;  %s922_s23 = scalar_lea.vmem [#allocation2], %s1687_s13  ;;  %v1032_v22 = vld [vmem:[%s1031_s1] sm:$0xff]  ;;  %s1700_s13 = sshll.u32 %s2311_s16, 3 }
 0x302   : > { %1849 = vmatpush3.msra.mxu1 %v2196_v14  ;;  %1856 = vmatprep.mubr.msk.f32.mxu1 %vm2075_vm1, %v2074_v19  ;;  %v923_v63 = vld [vmem:[%s922_s23] sm:$0xff]  ;;  %s1358_s23 = scalar_lea.vmem [#allocation2], %s1700_s13  ;;  %s1483_s1 = sshll.u32 %s2333_s14, 4  ;;  %s2477_s1 = int_to_ptr.vmem [resolvable:$true] %s1483_s1 }
 0x303   : > { %1850 = vmatprep.subr.mxu1 %v2074_v19  ;;  %s2078_s16 = smov [#allocation3]  }
 0x304   : > { %1851 = vmatpush3.msra.mxu1 %v2219_v20 }
 0x305   : > { %1852 = vmatprep.subr.mxu1 %v2074_v19 }
 0x306   : > { %1853 = vmatpush3.msra.mxu1 %v2242_v25 }
 0x307   : > { %1854 = vmatprep.subr.mxu1 %v2074_v19 }
 0x308   : > { %1855 = vmatpush3.msra.mxu1 %v2256_v28 }
 0x309   : > { %1870 = vmatprep.subr.mxu1 %v2074_v19 }
 0x3c1   : > { %v774_v24 = vpop.f32.mrf.mxu1 }
 0x3c2   : > { %v778_v26 = vadd.f32 %v774_v24, %v705_v23 }
 0x3c3   : > { %v1836_v27 = vpop.f32.mrf.mxu1 }
 0x3c4   : > { %v1682_v29 = vmul.f32 -1.442695, %v778_v26 }
 0x3c6   : > { %1956 = vpow2.f32 %v1682_v29 }
 0x3c7   : > { %1958 = vtanh.f32 %v778_v26 }
 0x3d3   : > { %v1957_v30 = vpop.eup %1956 }
 0x3d4   : > { %v783_v31 = vadd.f32 1.0, %v1957_v30  ;;  %v1959_v32 = vpop.eup %1958 }
 0x3d6   : > { %1960 = vrcp.f32 %v783_v31 }
 0x3e3   : > { %v1961_v33 = vpop.eup %1960 }
 0x3e4   : > { %v786_v34 = vsel %vm2320_vm4, %v1959_v32, %v1961_v33 }
 0x3e5   : > { %789 = vrot.lane.b32.xlu0 %v786_v34, %s2076_s26  ;;  %v787_v37 = vmul.f32 %v786_v34, %v689_v16 }
 0x457   : > { %v790_v35 = vpop.permute.xlu0 %789 }
 0x458   : > { %v792_v36 = vmul.f32 %v790_v35, %v786_v34 }
 0x45a   : > { %794 = vrot.lane.b32.xlu1 %v792_v36, %s2077_s6 }
 0x4cc   : > { %v795_v38 = vpop.permute.xlu1 %794 }
 0x4cd   : > { %v797_v39 = vadd.f32 %v795_v38, %v787_v37 }
 0x4cf   : > { %1962 = vtanh.f32 %v797_v39 }
 0x4dc   : > { %v1963_v40 = vpop.eup %1962 }
 0x4dd   : > { %800 = vrot.lane.b32.xlu0 %v1963_v40, %s2076_s26 }
 0x54f   : > { %v801_v41 = vpop.permute.xlu0 %800 }
 0x550   : > { %v803_v42 = vmul.f32 %v801_v41, %v786_v34 }
 0x552   : > { %805 = vrot.lane.b32.xlu1 %v803_v42, %s2077_s6 }
 0x5c4   : > { %v806_v43 = vpop.permute.xlu1 %805 }
 0x5c5   : > { %809 = vst.msk [vmem:[%s808_s30] sm:$0xff] %vm289_vm0, %v806_v43  ;;  %1846 = vmatmul.mubr.msk.f32.vlgmr.msra.gmra.mxu0 %vm289_vm0, %v806_v43  ;;  %s1694_s30 = sshll.u32 %s2303_s12, 3 }
 0x5c6   : > { %1860 = vmatpush3.msra.mxu0 %v2196_v14  ;;  %1867 = vmatprep.mubr.msk.f32.mxu0 %vm2075_vm1, %v2074_v19  ;;  %s1140_s17 = scalar_lea.vmem [#allocation2], %s1694_s30  ;;  %s1244_s12 = scalar_lea.vmem %s2333_s14, %s1694_s30 [#allocation3] }
 0x5c7   : > { %1861 = vmatprep.subr.mxu0 %v2074_v19  ;;  %v1141_v43 = vld [vmem:[%s1140_s17] sm:$0xff] }
 0x5c8   : > { %1862 = vmatpush3.msra.mxu0 %v2219_v20 }
 0x5c9   : > { %1863 = vmatprep.subr.mxu0 %v2074_v19 }
 0x5ca   : > { %1864 = vmatpush3.msra.mxu0 %v2242_v25 }
 0x5cb   : > { %1865 = vmatprep.subr.mxu0 %v2074_v19 }
 0x5cc   : > { %1866 = vmatpush3.msra.mxu0 %v2256_v28 }
 0x5cd   : > { %1881 = vmatprep.subr.mxu0 %v2074_v19 }
 0x685   : > { %v883_v45 = vpop.f32.mrf.mxu0 }
 0x686   : > { %v887_v46 = vadd.f32 %v883_v45, %v814_v44 }
 0x687   : > { %v1847_v47 = vpop.f32.mrf.mxu0 }
 0x688   : > { %v1686_v48 = vmul.f32 -1.442695, %v887_v46 }
 0x68a   : > { %1964 = vpow2.f32 %v1686_v48 }
 0x68b   : > { %1966 = vtanh.f32 %v887_v46 }
 0x697   : > { %v1965_v49 = vpop.eup %1964 }
 0x698   : > { %v892_v50 = vadd.f32 1.0, %v1965_v49  ;;  %v1967_v51 = vpop.eup %1966 }
 0x69a   : > { %1968 = vrcp.f32 %v892_v50 }
 0x6a7   : > { %v1969_v52 = vpop.eup %1968 }
 0x6a8   : > { %v895_v53 = vsel %vm2320_vm4, %v1967_v51, %v1969_v52 }
 0x6a9   : > { %898 = vrot.lane.b32.xlu0 %v895_v53, %s2076_s26  ;;  %v896_v56 = vmul.f32 %v895_v53, %v797_v39 }
 0x71b   : > { %v899_v54 = vpop.permute.xlu0 %898 }
 0x71c   : > { %v901_v55 = vmul.f32 %v899_v54, %v895_v53 }
 0x71e   : > { %903 = vrot.lane.b32.xlu1 %v901_v55, %s2077_s6 }
 0x790   : > { %v904_v57 = vpop.permute.xlu1 %903 }
 0x791   : > { %v906_v58 = vadd.f32 %v904_v57, %v896_v56 }
 0x793   : > { %1970 = vtanh.f32 %v906_v58 }
 0x7a0   : > { %v1971_v59 = vpop.eup %1970 }
 0x7a1   : > { %909 = vrot.lane.b32.xlu0 %v1971_v59, %s2076_s26 }
 0x813   : > { %v910_v60 = vpop.permute.xlu0 %909 }
 0x814   : > { %v912_v61 = vmul.f32 %v910_v60, %v895_v53 }
 0x816   : > { %914 = vrot.lane.b32.xlu1 %v912_v61, %s2077_s6 }
 0x888   : > { %v915_v62 = vpop.permute.xlu1 %914 }
 0x889   : > { %918 = vst.msk [vmem:[%s917_s25] sm:$0xff] %vm289_vm0, %v915_v62  ;;  %1857 = vmatmul.mubr.msk.f32.vlgmr.msra.gmra.mxu1 %vm289_vm0, %v915_v62  ;;  %s1249_s25 = scalar_lea.vmem [#allocation2], %s1697_s11 }
 0x88a   : > { %1871 = vmatpush3.msra.mxu1 %v2196_v14  ;;  %1878 = vmatprep.mubr.msk.f32.mxu1 %vm2075_vm1, %v2074_v19  ;;  %v1250_v57 = vld [vmem:[%s1249_s25] sm:$0xff] }
 0x88b   : > { %1872 = vmatprep.subr.mxu1 %v2074_v19 }
 0x88c   : > { %1873 = vmatpush3.msra.mxu1 %v2219_v20 }
 0x88d   : > { %1874 = vmatprep.subr.mxu1 %v2074_v19 }
 0x88e   : > { %1875 = vmatpush3.msra.mxu1 %v2242_v25 }
 0x88f   : > { %1876 = vmatprep.subr.mxu1 %v2074_v19 }
 0x890   : > { %1877 = vmatpush3.msra.mxu1 %v2256_v28 }
 0x891   : > { %1892 = vmatprep.subr.mxu1 %v2074_v19 }
 0x949   : > { %v992_v0 = vpop.f32.mrf.mxu1 }
 0x94a   : > { %v996_v1 = vadd.f32 %v992_v0, %v923_v63 }
 0x94b   : > { %v1858_v2 = vpop.f32.mrf.mxu1 }
 0x94c   : > { %v1689_v3 = vmul.f32 -1.442695, %v996_v1 }
 0x94e   : > { %1972 = vpow2.f32 %v1689_v3 }
 0x94f   : > { %1974 = vtanh.f32 %v996_v1 }
 0x95b   : > { %v1973_v4 = vpop.eup %1972 }
 0x95c   : > { %v1001_v5 = vadd.f32 1.0, %v1973_v4  ;;  %v1975_v6 = vpop.eup %1974 }
 0x95e   : > { %1976 = vrcp.f32 %v1001_v5 }
 0x96b   : > { %v1977_v8 = vpop.eup %1976 }
 0x96c   : > { %v1004_v9 = vsel %vm2320_vm4, %v1975_v6, %v1977_v8 }
 0x96d   : > { %1007 = vrot.lane.b32.xlu0 %v1004_v9, %s2076_s26  ;;  %v1005_v12 = vmul.f32 %v1004_v9, %v906_v58 }
 0x9df   : > { %v1008_v10 = vpop.permute.xlu0 %1007 }
 0x9e0   : > { %v1010_v11 = vmul.f32 %v1008_v10, %v1004_v9 }
 0x9e2   : > { %1012 = vrot.lane.b32.xlu1 %v1010_v11, %s2077_s6 }
 0xa54   : > { %v1013_v13 = vpop.permute.xlu1 %1012 }
 0xa55   : > { %v1015_v15 = vadd.f32 %v1013_v13, %v1005_v12  ;;  %v1359_v13 = vld [vmem:[%s1358_s23] sm:$0xff] }
 0xa57   : > { %1978 = vtanh.f32 %v1015_v15 }
 0xa64   : > { %v1979_v16 = vpop.eup %1978 }
 0xa65   : > { %1018 = vrot.lane.b32.xlu0 %v1979_v16, %s2076_s26 }
 0xad7   : > { %v1019_v17 = vpop.permute.xlu0 %1018 }
 0xad8   : > { %v1021_v18 = vmul.f32 %v1019_v17, %v1004_v9 }
 0xada   : > { %1023 = vrot.lane.b32.xlu1 %v1021_v18, %s2077_s6 }
 0xb4c   : > { %v1024_v21 = vpop.permute.xlu1 %1023 }
 0xb4d   : > { %1027 = vst.msk [vmem:[%s1026_s7] sm:$0xff] %vm289_vm0, %v1024_v21  ;;  %1868 = vmatmul.mubr.msk.f32.vlgmr.msra.gmra.mxu0 %vm289_vm0, %v1024_v21  ;;  %s1660_s7 = sshll.u32 %s2169_s9, 3  ;;  %s2012_s9 = scalar_lea.vmem %s2477_s1, 1024 }
 0xb4e   : > { %1882 = vmatpush3.msra.mxu0 %v2196_v14  ;;  %1889 = vmatprep.mubr.msk.f32.mxu0 %vm2075_vm1, %v2074_v19  ;;  %p2013_p12 = scmp.ne.s32.totalorder %s2477_s1, %s2012_s9 }
 0xb4f   : > { %1883 = vmatprep.subr.mxu0 %v2074_v19 }
 0xb50   : > { %1884 = vmatpush3.msra.mxu0 %v2219_v20  ;;  %p2014_p13 = pnand %p2013_p12, %p2149_p5 }
 0xb51   : > { %1885 = vmatprep.subr.mxu0 %v2074_v19 }
 0xb52   : > { %1886 = vmatpush3.msra.mxu0 %v2242_v25  ;;  %p2015_p0 = pneg %p2014_p13 }
 0xb53   : > { %1887 = vmatprep.subr.mxu0 %v2074_v19 }
 0xb54   : > { %1888 = vmatpush3.msra.mxu0 %v2256_v28 }
 0xc0d   : > { %v1101_v23 = vpop.f32.mrf.mxu0 }
 0xc0e   : > { %v1105_v24 = vadd.f32 %v1101_v23, %v1032_v22 }
 0xc0f   : > { %v1869_v26 = vpop.f32.mrf.mxu0 }
 0xc10   : > { %v1693_v27 = vmul.f32 -1.442695, %v1105_v24 }
 0xc12   : > { %1980 = vpow2.f32 %v1693_v27 }
 0xc13   : > { %1982 = vtanh.f32 %v1105_v24 }
 0xc1f   : > { %v1981_v29 = vpop.eup %1980 }
 0xc20   : > { %v1110_v30 = vadd.f32 1.0, %v1981_v29  ;;  %v1983_v31 = vpop.eup %1982 }
 0xc22   : > { %1984 = vrcp.f32 %v1110_v30 }
 0xc2f   : > { %v1985_v32 = vpop.eup %1984 }
 0xc30   : > { %v1113_v33 = vsel %vm2320_vm4, %v1983_v31, %v1985_v32 }
 0xc31   : > { %1116 = vrot.lane.b32.xlu0 %v1113_v33, %s2076_s26  ;;  %v1114_v36 = vmul.f32 %v1113_v33, %v1015_v15 }
 0xca3   : > { %v1117_v34 = vpop.permute.xlu0 %1116 }
 0xca4   : > { %v1119_v35 = vmul.f32 %v1117_v34, %v1113_v33 }
 0xca6   : > { %1121 = vrot.lane.b32.xlu1 %v1119_v35, %s2077_s6 }
 0xd18   : > { %v1122_v37 = vpop.permute.xlu1 %1121 }
 0xd19   : > { %v1124_v38 = vadd.f32 %v1122_v37, %v1114_v36 }
 0xd1b   : > { %1986 = vtanh.f32 %v1124_v38 }
 0xd28   : > { %v1987_v39 = vpop.eup %1986 }
 0xd29   : > { %1127 = vrot.lane.b32.xlu0 %v1987_v39, %s2076_s26 }
 0xd9b   : > { %v1128_v40 = vpop.permute.xlu0 %1127 }
 0xd9c   : > { %v1130_v41 = vmul.f32 %v1128_v40, %v1113_v33 }
 0xd9e   : > { %1132 = vrot.lane.b32.xlu1 %v1130_v41, %s2077_s6 }
 0xe10   : > { %v1133_v42 = vpop.permute.xlu1 %1132 }
 0xe11   : > { %1136 = vst.msk [vmem:[%s1135_s10] sm:$0xff] %vm289_vm0, %v1133_v42  ;;  %1879 = vmatmul.mubr.msk.f32.vlgmr.msra.gmra.mxu1 %vm289_vm0, %v1133_v42  ;;  %s1462_s10 = scalar_lea.vmem %s2333_s14, %s1700_s13 [#allocation3] }
 0xe12   : > { %1893 = vmatpush3.msra.mxu1 %v2196_v14  ;;  %1900 = vmatprep.mubr.msk.f32.mxu1 %vm2075_vm1, %v2074_v19 }
 0xe13   : > { %1894 = vmatprep.subr.mxu1 %v2074_v19 }
 0xe14   : > { %1895 = vmatpush3.msra.mxu1 %v2219_v20 }
 0xe15   : > { %1896 = vmatprep.subr.mxu1 %v2074_v19 }
 0xe16   : > { %1897 = vmatpush3.msra.mxu1 %v2242_v25 }
 0xe17   : > { %1898 = vmatprep.subr.mxu1 %v2074_v19 }
 0xe18   : > { %1899 = vmatpush3.msra.mxu1 %v2256_v28 }
 0xed1   : > { %v1210_v44 = vpop.f32.mrf.mxu1 }
 0xed2   : > { %v1214_v14 = vadd.f32 %v1210_v44, %v1141_v43 }
 0xed3   : > { %v1880_v45 = vpop.f32.mrf.mxu1 }
 0xed4   : > { %v1696_v46 = vmul.f32 -1.442695, %v1214_v14 }
 0xed6   : > { %1988 = vpow2.f32 %v1696_v46 }
 0xed7   : > { %1990 = vtanh.f32 %v1214_v14 }
 0xee3   : > { %v1989_v47 = vpop.eup %1988 }
 0xee4   : > { %v1219_v48 = vadd.f32 1.0, %v1989_v47  ;;  %v1991_v20 = vpop.eup %1990 }
 0xee6   : > { %1992 = vrcp.f32 %v1219_v48 }
 0xef3   : > { %v1993_v49 = vpop.eup %1992 }
 0xef4   : > { %v1222_v19 = vsel %vm2320_vm4, %v1991_v20, %v1993_v49 }
 0xef5   : > { %1225 = vrot.lane.b32.xlu0 %v1222_v19, %s2076_s26  ;;  %v1223_v50 = vmul.f32 %v1222_v19, %v1124_v38 }
 0xf67   : > { %v1226_v25 = vpop.permute.xlu0 %1225 }
 0xf68   : > { %v1228_v28 = vmul.f32 %v1226_v25, %v1222_v19 }
 0xf6a   : > { %1230 = vrot.lane.b32.xlu1 %v1228_v28, %s2077_s6 }
 0xfdc   : > { %v1231_v51 = vpop.permute.xlu1 %1230 }
 0xfdd   : > { %v1233_v52 = vadd.f32 %v1231_v51, %v1223_v50 }
 0xfdf   : > { %1994 = vtanh.f32 %v1233_v52 }
 0xfec   : > { %v1995_v53 = vpop.eup %1994 }
 0xfed   : > { %1236 = vrot.lane.b32.xlu0 %v1995_v53, %s2076_s26 }
0x105f   : > { %v1237_v54 = vpop.permute.xlu0 %1236 }
0x1060   : > { %v1239_v55 = vmul.f32 %v1237_v54, %v1222_v19 }
0x1062   : > { %1241 = vrot.lane.b32.xlu1 %v1239_v55, %s2077_s6 }
0x10d4   : > { %v1242_v56 = vpop.permute.xlu1 %1241 }
0x10d5   : > { %1245 = vst.msk [vmem:[%s1244_s12] sm:$0xff] %vm289_vm0, %v1242_v56  ;;  %1890 = vmatmul.mubr.msk.f32.vlgmr.msra.gmra.mxu0 %vm289_vm0, %v1242_v56  ;;  %s267_s12 = scalar_lea.vmem %s2528_s5, %s1660_s7 }
0x1195   : > { %v1319_v58 = vpop.f32.mrf.mxu0 }
0x1196   : > { %v1323_v59 = vadd.f32 %v1319_v58, %v1250_v57 }
0x1197   : > { %v1891_v60 = vpop.f32.mrf.mxu0 }
0x1198   : > { %v1699_v61 = vmul.f32 -1.442695, %v1323_v59 }
0x119a   : > { %1996 = vpow2.f32 %v1699_v61 }
0x119b   : > { %1998 = vtanh.f32 %v1323_v59 }
0x11a7   : > { %v1997_v62 = vpop.eup %1996 }
0x11a8   : > { %v1328_v63 = vadd.f32 1.0, %v1997_v62  ;;  %v1999_v0 = vpop.eup %1998 }
0x11aa   : > { %2000 = vrcp.f32 %v1328_v63 }
0x11b7   : > { %v2001_v1 = vpop.eup %2000 }
0x11b8   : > { %v1331_v2 = vsel %vm2320_vm4, %v1999_v0, %v2001_v1 }
0x11b9   : > { %1334 = vrot.lane.b32.xlu0 %v1331_v2, %s2076_s26  ;;  %v1332_v5 = vmul.f32 %v1331_v2, %v1233_v52 }
0x122b   : > { %v1335_v3 = vpop.permute.xlu0 %1334 }
0x122c   : > { %v1337_v4 = vmul.f32 %v1335_v3, %v1331_v2 }
0x122e   : > { %1339 = vrot.lane.b32.xlu1 %v1337_v4, %s2077_s6 }
0x12a0   : > { %v1340_v6 = vpop.permute.xlu1 %1339 }
0x12a1   : > { %v1342_v8 = vadd.f32 %v1340_v6, %v1332_v5 }
0x12a3   : > { %2002 = vtanh.f32 %v1342_v8 }
0x12b0   : > { %v2003_v9 = vpop.eup %2002 }
0x12b1   : > { %1345 = vrot.lane.b32.xlu0 %v2003_v9, %s2076_s26 }
0x1323   : > { %v1346_v10 = vpop.permute.xlu0 %1345 }
0x1324   : > { %v1348_v11 = vmul.f32 %v1346_v10, %v1331_v2 }
0x1326   : > { %1350 = vrot.lane.b32.xlu1 %v1348_v11, %s2077_s6 }
0x1398   : > { %v1351_v12 = vpop.permute.xlu1 %1350 }
0x1399   : > { %1354 = vst.msk [vmem:[%s1353_s15] sm:$0xff] %vm289_vm0, %v1351_v12  ;;  %1901 = vmatmul.mubr.msk.f32.vlgmr.msra.gmra.mxu1 %vm289_vm0, %v1351_v12  ;;  %s2475_s15 = scalar_lea.hbm %s2527_s4, %s1710_s0 }
0x1459   : > { %v1428_v15 = vpop.f32.mrf.mxu1 }
0x145a   : > { %v1432_v16 = vadd.f32 %v1428_v15, %v1359_v13 }
0x145b   : > { %v1902_v17 = vpop.f32.mrf.mxu1 }
0x145c   : > { %v1702_v18 = vmul.f32 -1.442695, %v1432_v16 }
0x145e   : > { %2004 = vpow2.f32 %v1702_v18 }
0x145f   : > { %2006 = vtanh.f32 %v1432_v16 }
0x146b   : > { %v2005_v21 = vpop.eup %2004 }
0x146c   : > { %v1437_v22 = vadd.f32 1.0, %v2005_v21  ;;  %v2007_v23 = vpop.eup %2006 }
0x146e   : > { %2008 = vrcp.f32 %v1437_v22 }
0x147b   : > { %v2009_v24 = vpop.eup %2008 }
0x147c   : > { %v1440_v26 = vsel %vm2320_vm4, %v2007_v23, %v2009_v24 }
0x147d   : > { %1443 = vrot.lane.b32.xlu0 %v1440_v26, %s2076_s26  ;;  %v1441_v30 = vmul.f32 %v1440_v26, %v1342_v8 }
0x14ef   : > { %v1444_v27 = vpop.permute.xlu0 %1443 }
0x14f0   : > { %v1446_v29 = vmul.f32 %v1444_v27, %v1440_v26 }
0x14f2   : > { %1448 = vrot.lane.b32.xlu1 %v1446_v29, %s2077_s6 }
0x1564   : > { %v1449_v31 = vpop.permute.xlu1 %1448 }
0x1565   : > { %v1451_v32 = vadd.f32 %v1449_v31, %v1441_v30 }
0x1567   : > { %2010 = vtanh.f32 %v1451_v32 }
0x1574   : > { %v2011_v33 = vpop.eup %2010 }
0x1575   : > { %1454 = vrot.lane.b32.xlu0 %v2011_v33, %s2076_s26  ;;  %s2016_s26 = sshll.u32 %s2078_s16, 4  ;;  %s2017_s26 = int_to_ptr.vmem [resolvable:$false] %s2016_s26 }
0x1576   : > { %p2019_p1 = scmp.lt.s32.totalorder %s2477_s1, %s2017_s26 }
0x15e7   : > { %v1455_v7 = vpop.permute.xlu0 %1454 }
0x15e8   : > { %v1457_v34 = vmul.f32 %v1455_v7, %v1440_v26 }
0x15ea   : > { %1459 = vrot.lane.b32.xlu1 %v1457_v34, %s2077_s6  ;;  %s2018_s6 = scalar_lea.vmem %s2017_s26, 2048 }
0x15eb   : > { %p2020_p2 = scmp.lt.s32.totalorder %s2018_s6, %s2012_s9 }
0x15ed   : > { %p2021_p3 = por %p2020_p2, %p2019_p1 }
0x15ef   : > { %p2022_p4 = pnand %p2021_p3, %p2015_p0 }
0x165c   : > { %v1460_v35 = vpop.permute.xlu1 %1459 }
0x165d   : > { %1463 = vst.msk [vmem:[%s1462_s10] sm:$0xff] %vm289_vm0, %v1460_v35  ;;  %1464 = vst.msk [vmem:[%s267_s12] sm:$0xff] %vm289_vm0, %v1460_v35 }
0x165e   : > { %2025 = shalt.err (!%p2022_p4)
}
0x165f   : > { %s2026_s8 = scalar_lea.hbm %s2475_s15, 1024  ;;  %s2030_s23 = scalar_lea.hbm %s2527_s4, 2048 }
0x1660   : > { %p2027_p7 = scmp.ne.s32.totalorder %s2475_s15, %s2026_s8  ;;  %p2031_p10 = scmp.lt.s32.totalorder %s2475_s15, %s2527_s4 }
0x1661   : > { %p2032_p11 = scmp.lt.s32.totalorder %s2030_s23, %s2026_s8 }
0x1662   : > { %p2028_p8 = pnand %p2027_p7, %p2149_p5 }
0x1663   : > { %p2033_p12 = por %p2032_p11, %p2031_p10 }
0x1664   : > { %p2029_p9 = pneg %p2028_p8 }
0x1666   : > { %p2034_p13 = pnand %p2033_p12, %p2029_p9 }
0x1668   : > { %2037 = shalt.err (!%p2034_p13)
}
0x1669   : > { %s2079_s10 = smov 128   ;;  %s2080_s30 = smov 8  }
0x166a   : > { %1903 = dma.vmem_to_hbm [thread:$0]  (%p2149_p5), %s2477_s1, 1024, %s2475_s15, %s2483_s22, %s2079_s10, %s2079_s10, %s2080_s30  }
0x166b PF: > { %p1909_p0 = scmp.ge.s32.totalorder %s2072_s21, 2  ;;  %s1501_s17 = sand.u32 1, %s2060_s18  }
0x166c   : > { %s1502_s12 = scalar_lea.sflag [#allocation4], %s1501_s17 }
0x166d   : > { %p1906_p1 = pnand %p1909_p0, %p2153_p6 }
0x166f   : > { %p1907_p2 = pneg %p1906_p1 }
0x1671   : > { %2055 = dma.done.wait (%p1907_p2), %s1502_s12, 1024  }
0x1672   : > { %2057 = vsyncadd (%p1907_p2), %s1502_s12, 4294966272  ;;  %p16_p3 = scmp.ge.s32.totalorder %s2136_s24, 4   ;;  %s2537_s18 = smov %s2064_s19 }
0x1673   : > { %s2538_s19 = smov %s2068_s20  ;;  %s2539_s20 = smov %s2147_s27 }
0x1674   : > { %s2540_s21 = smov %s2136_s24  ;;  %18 = sbr.rel (!%p16_p3) target bundleno = 6 (0x6), region = 105 }
0x1679   :  { %1514 = vsyncpa [#allocation4], 1 }
0x167a   :  { %1516 = vsyncpa [#allocation4 + $0x1], 1 }

</bundles_post_ra>
